<compile_context>
chip_gen: v7x
topology: tpu7x:2x2x1
jax: 0.10.0
libtpu: 0.0.40
codegen_flags: <defaults>
</compile_context>

<pallas_src>
import functools
import math

import jax
import jax.numpy as jnp
from jax import lax
from jax.experimental import pallas as pl
from jax.experimental.pallas import tpu as pltpu


def _round_up(a: int, m: int) -> int:
    return (a + m - 1) // m * m


def _qk_attention_kernel(x_ref, kin_ref, wq_ref, wk_ref, o_ref, kt_ref, *,
                         heads_per_group: int, dh: int):
    """One grid step = (batch bi, head-group gi, query tile qi).

    x_ref:   (block_q, dim)          query-side activations (compute dtype)
    kin_ref: (n_k_pad, dim)          key-side activations, full (padded) sequence
    wq_ref:  (hg*dh, dim)            head-group slice of Wq (scale pre-folded)
    wk_ref:  (hg, dh, dim)           head-group slice of Wk
    o_ref:   (hg, block_q, n_k_pad)  dots output block
    kt_ref:  VMEM scratch (hg, dh, n_k_pad) — cached K^T for this (batch, head-group)
    """
    dn = (((1,), (1,)), ((), ()))  # contract the feature axis of both operands

    # --- K projection: only when the query-tile index resets (new batch / head-group). ---
    @pl.when(pl.program_id(2) == 0)
    def _():
        for h in range(heads_per_group):
            kt = lax.dot_general(wk_ref[h], kin_ref[...], dn,
                                 preferred_element_type=jnp.float32)  # (dh, n_k_pad) == K^T
            kt_ref[h] = kt.astype(kt_ref.dtype)

    # --- Q projection for the whole head group (scale already folded into Wq). ---
    q = lax.dot_general(x_ref[...], wq_ref[...], dn,
                        preferred_element_type=jnp.float32)           # (block_q, hg*dh)
    q = q.astype(x_ref.dtype)  # back to the MXU input dtype for the dots matmul

    # --- Per-head dots: (block_q, dh) @ (dh, n_k_pad), f32 accumulate. ---
    for h in range(heads_per_group):
        q_h = q[:, h * dh:(h + 1) * dh]
        dots = jnp.dot(q_h, kt_ref[h], preferred_element_type=jnp.float32)
        o_ref[h] = dots.astype(o_ref.dtype)


def qk_attention_pallas(x, kin, wq, wk, *, heads: int, scale: float,
                        block_q: int | None = None, heads_per_group: int | None = None,
                        compute_dtype=jnp.bfloat16, out_dtype=None,
                        vmem_limit_bytes: int | None = None):
    """Fused q/k projection + scaled Q·K^T.

    x:   (b, n, dim)     query-side input
    kin: (b, n_k, dim)   key-side input
    wq, wk: (dim, dim)   nn.Linear weights (out, in), no bias
    returns dots: (b, heads, n, n_k) in `out_dtype` (default x.dtype)

    block_q defaults to 256; on v6e's 128 MiB VMEM it can profitably be raised to 512-1024.
    """
    b, n, dim = x.shape
    bk, n_k, dim_k = kin.shape
    assert bk == b and dim_k == dim, "x and k must share batch / feature dims"
    assert dim % heads == 0, "dim must be divisible by heads"
    dh = dim // heads

    out_dtype = out_dtype or x.dtype
    compute_dtype = compute_dtype or x.dtype

    # Head grouping: largest divisor of `heads` with hg*dh <= 256 (fills the MXU N dim on
    # the fused Q projection; use 128 as the target when tuning specifically for v5e).
    if heads_per_group is None:
        heads_per_group = 1
        for cand in range(heads, 0, -1):
            if heads % cand == 0 and cand * dh <= 256:
                heads_per_group = cand
                break
    assert heads % heads_per_group == 0
    hg = heads_per_group
    num_groups = heads // hg

    # Query tile (multiple of 8 sublanes); key length padded lane-dense (multiple of 128).
    if block_q is None:
        block_q = min(256, _round_up(n, 8))
    block_q = _round_up(block_q, 8)
    n_pad = _round_up(n, block_q)
    n_k_pad = _round_up(n_k, 128)

    # Fold the scale into Wq (free) and keep everything in the MXU compute dtype.
    wq_g = (wq * scale).reshape(num_groups, hg * dh, dim).astype(compute_dtype)
    wk_g = wk.reshape(num_groups, hg, dh, dim).astype(compute_dtype)

    x_p = x.astype(compute_dtype)
    kin_p = kin.astype(compute_dtype)
    if n_pad != n:
        x_p = jnp.pad(x_p, ((0, 0), (0, n_pad - n), (0, 0)))
    if n_k_pad != n_k:
        kin_p = jnp.pad(kin_p, ((0, 0), (0, n_k_pad - n_k), (0, 0)))

    if vmem_limit_bytes is None:
        cb = jnp.dtype(compute_dtype).itemsize
        ob = jnp.dtype(out_dtype).itemsize
        est = (2 * block_q * dim * cb                # x (double-buffered)
               + 2 * n_k_pad * dim * cb              # key-side activations
               + 2 * 2 * hg * dh * dim * cb          # Wq + Wk group slices
               + 2 * hg * block_q * n_k_pad * ob     # dots output block
               + hg * dh * n_k_pad * cb)             # cached K^T scratch
        try:  # generation-aware cap (64 MiB VMEM on v7x, 128 MiB on v5e/v6e)
            cap = int(pltpu.get_tpu_info().vmem_capacity_bytes)
        except Exception:
            cap = 64 << 20
        vmem_limit_bytes = max(32 << 20, min(int(est * 1.25) + (2 << 20), (cap * 3) // 4))

    kernel = functools.partial(_qk_attention_kernel, heads_per_group=hg, dh=dh)
    grid = (b, num_groups, n_pad // block_q)

    out = pl.pallas_call(
        kernel,
        out_shape=jax.ShapeDtypeStruct((b, heads, n_pad, n_k_pad), out_dtype),
        grid_spec=pltpu.PrefetchScalarGridSpec(
            num_scalar_prefetch=0,
            grid=grid,
            in_specs=[
                # x: one query tile of one batch element
                pl.BlockSpec((None, block_q, dim), lambda bi, gi, qi: (bi, qi, 0)),
                # key input: full (padded) key sequence of one batch element
                # (block index only depends on bi -> re-DMAed only when the batch changes)
                pl.BlockSpec((None, n_k_pad, dim), lambda bi, gi, qi: (bi, 0, 0)),
                # per-head-group projection weights
                pl.BlockSpec((None, hg * dh, dim), lambda bi, gi, qi: (gi, 0, 0)),
                pl.BlockSpec((None, hg, dh, dim), lambda bi, gi, qi: (gi, 0, 0, 0)),
            ],
            out_specs=pl.BlockSpec((None, hg, block_q, n_k_pad),
                                   lambda bi, gi, qi: (bi, gi, qi, 0)),
            scratch_shapes=[pltpu.VMEM((hg, dh, n_k_pad), compute_dtype)],
        ),
        compiler_params=pltpu.CompilerParams(
            # q-tile axis must be "arbitrary" so the K^T scratch reuse is well defined;
            # batch / head-group stay "parallel" for megacore sharding.
            dimension_semantics=("parallel", "parallel", "arbitrary"),
            vmem_limit_bytes=vmem_limit_bytes,
        ),
    )(x_p, kin_p, wq_g, wk_g)

    if n_pad != n or n_k_pad != n_k:
        out = out[:, :, :n, :n_k]
    return out


class QKAttention:
    """JAX/Pallas port of the PyTorch QKAttention module (forward only)."""

    def __init__(self, dim, heads=8, dropout=0.0, scale_with_head=False, *,
                 key=None, compute_dtype=jnp.bfloat16):
        assert dim % heads == 0
        self.dim = dim
        self.heads = heads
        self.scale = (dim // heads) ** (-0.5) if scale_with_head else dim ** (-0.5)
        # compute_dtype: dtype fed to the MXU. bf16 (default) gives ~4x MXU throughput on
        # v6e/v7x with f32 accumulation; pass jnp.float32 (or None) for exact f32 parity.
        self.compute_dtype = compute_dtype
        if key is None:
            key = jax.random.PRNGKey(0)
        kq, kk = jax.random.split(key)
        # nn.Linear default init: U(-1/sqrt(in), 1/sqrt(in)), weight shape (out, in)
        bound = 1.0 / math.sqrt(dim)
        self.wq = jax.random.uniform(kq, (dim, dim), jnp.float32, -bound, bound)
        self.wk = jax.random.uniform(kk, (dim, dim), jnp.float32, -bound, bound)
        self.dropout = dropout  # declared but unused in the torch forward; kept for parity

    def __call__(self, x, k=None, v=None, img=None, mask=None):
        # TODO(synk): mask path (F.pad(mask,(1,0)) outer product + masked_fill) not
        # implemented; `v` / `img` / dropout are unused by the torch forward as well.
        assert mask is None, "mask path not implemented in the Pallas port"
        if k is None:
            k = x  # torch would error on None; treat as self-attention keys
        return qk_attention_pallas(x, k, self.wq, self.wk,
                                   heads=self.heads, scale=self.scale,
                                   compute_dtype=self.compute_dtype)


if __name__ == "__main__":
    batch, seq, dim, heads = 2, 8, 32, 8
    dh = dim // heads

    key = jax.random.PRNGKey(0)
    kx, kk_in, kmod = jax.random.split(key, 3)
    x = jax.random.normal(kx, (batch, seq, dim), dtype=jnp.float32)
    k_in = jax.random.normal(kk_in, (batch, seq, dim), dtype=jnp.float32)

    # Pure-JAX reference (torch semantics: y = x @ W^T, rearrange, einsum, scale).
    module = QKAttention(dim, heads=heads, scale_with_head=False, key=kmod)
    hp = jax.lax.Precision.HIGHEST
    q_ref = jnp.einsum("bnd,od->bno", x, module.wq, precision=hp)
    k_ref = jnp.einsum("bnd,od->bno", k_in, module.wk, precision=hp)
    q_ref = q_ref.reshape(batch, seq, heads, dh).transpose(0, 2, 1, 3)
    k_ref = k_ref.reshape(batch, seq, heads, dh).transpose(0, 2, 1, 3)
    ref = jnp.einsum("bhid,bhjd->bhij", q_ref, k_ref, precision=hp) * module.scale

    # 1) bf16 MXU path (default, the performance-recommended configuration).
    dots_bf16 = jax.block_until_ready(module(x, k=k_in))
    assert dots_bf16.shape == (batch, heads, seq, seq)
    assert float(jnp.max(jnp.abs(dots_bf16.astype(jnp.float32) - ref))) < 1e-1

    # 2) f32 compute path (exact parity with the torch module's default dtype).
    module_f32 = QKAttention(dim, heads=heads, scale_with_head=False, key=kmod,
                             compute_dtype=jnp.float32)
    dots_f32 = jax.block_until_ready(module_f32(x, k=k_in))
    assert dots_f32.shape == (batch, heads, seq, seq)
    assert float(jnp.max(jnp.abs(dots_f32 - ref))) < 2e-2

    print("KERNEL_OK")
</pallas_src>

<mosaic_0001>
module attributes {stable_mosaic.version = 11 : i64} {
  func.func @_qk_attention_kernel(%arg0: i32, %arg1: i32, %arg2: i32, %arg3: memref<1x8x32xbf16, #tpu.memory_space<vmem>>, %arg4: memref<1x128x32xbf16, #tpu.memory_space<vmem>>, %arg5: memref<1x32x32xbf16, #tpu.memory_space<vmem>>, %arg6: memref<1x8x4x32xbf16, #tpu.memory_space<vmem>>, %arg7: memref<1x8x8x128xf32, #tpu.memory_space<vmem>>, %arg8: memref<8x4x128xbf16, #tpu.memory_space<vmem>>) attributes {dimension_semantics = [#tpu.dimension_semantics<parallel>, #tpu.dimension_semantics<parallel>, #tpu.dimension_semantics<arbitrary>], iteration_bounds = array<i64: 2, 1, 1>, scalar_prefetch = 0 : i64, scratch_operands = 1 : i64, tpu.core_type = #tpu.core_type<tc>, window_params = [{transform_indices = @transform_0, window_bounds = array<i64: 1, 8, 32>}, {transform_indices = @transform_1, window_bounds = array<i64: 1, 128, 32>}, {transform_indices = @transform_2, window_bounds = array<i64: 1, 32, 32>}, {transform_indices = @transform_3, window_bounds = array<i64: 1, 8, 4, 32>}, {transform_indices = @transform_4, window_bounds = array<i64: 1, 8, 8, 128>}]} {
    %c0_i32 = arith.constant 0 : i32
    %0 = arith.cmpi eq, %arg2, %c0_i32 : i32
    %1 = arith.extui %0 : i1 to i32
    %c0_i32_0 = arith.constant 0 : i32
    %2 = arith.cmpi ne, %1, %c0_i32_0 : i32
    scf.if %2 {
      %c0_63 = arith.constant 0 : index
      %c0_64 = arith.constant 0 : index
      %c0_65 = arith.constant 0 : index
      %c0_66 = arith.constant 0 : index
      %65 = vector.load %arg6[%c0_63, %c0_64, %c0_65, %c0_66] : memref<1x8x4x32xbf16, #tpu.memory_space<vmem>>, vector<1x1x4x32xbf16>
      %66 = vector.shape_cast %65 : vector<1x1x4x32xbf16> to vector<4x32xbf16>
      %c0_67 = arith.constant 0 : index
      %c0_68 = arith.constant 0 : index
      %c0_69 = arith.constant 0 : index
      %67 = vector.load %arg4[%c0_67, %c0_68, %c0_69] : memref<1x128x32xbf16, #tpu.memory_space<vmem>>, vector<1x128x32xbf16>
      %68 = vector.shape_cast %67 : vector<1x128x32xbf16> to vector<128x32xbf16>
      %cst_70 = arith.constant dense<0.000000e+00> : vector<4x128xf32>
      %69 = tpu.matmul %66, %68, %cst_70 {dimension_numbers = #tpu.dot_dimension_numbers<[1], [1], [0], [0], [0, 0, 1, 0], [], []>} : vector<4x32xbf16>, vector<128x32xbf16>, vector<4x128xf32> -> vector<4x128xf32>
      %70 = arith.truncf %69 : vector<4x128xf32> to vector<4x128xbf16>
      %c0_71 = arith.constant 0 : index
      %c0_72 = arith.constant 0 : index
      %c0_73 = arith.constant 0 : index
      %71 = vector.load %arg8[%c0_71, %c0_72, %c0_73] : memref<8x4x128xbf16, #tpu.memory_space<vmem>>, vector<1x4x128xbf16>
      %72 = vector.shape_cast %71 : vector<1x4x128xbf16> to vector<4x128xbf16>
      %73 = vector.shape_cast %70 : vector<4x128xbf16> to vector<1x4x128xbf16>
      tpu.vector_store %arg8[%c0_71, %c0_72, %c0_73], %73 {strides = array<i32>} : memref<8x4x128xbf16, #tpu.memory_space<vmem>>, vector<1x4x128xbf16>,
      %c0_74 = arith.constant 0 : index
      %c1_75 = arith.constant 1 : index
      %c0_76 = arith.constant 0 : index
      %c0_77 = arith.constant 0 : index
      %74 = vector.load %arg6[%c0_74, %c1_75, %c0_76, %c0_77] : memref<1x8x4x32xbf16, #tpu.memory_space<vmem>>, vector<1x1x4x32xbf16>
      %75 = vector.shape_cast %74 : vector<1x1x4x32xbf16> to vector<4x32xbf16>
      %c0_78 = arith.constant 0 : index
      %c0_79 = arith.constant 0 : index
      %c0_80 = arith.constant 0 : index
      %76 = vector.load %arg4[%c0_78, %c0_79, %c0_80] : memref<1x128x32xbf16, #tpu.memory_space<vmem>>, vector<1x128x32xbf16>
      %77 = vector.shape_cast %76 : vector<1x128x32xbf16> to vector<128x32xbf16>
      %cst_81 = arith.constant dense<0.000000e+00> : vector<4x128xf32>
      %78 = tpu.matmul %75, %77, %cst_81 {dimension_numbers = #tpu.dot_dimension_numbers<[1], [1], [0], [0], [0, 0, 1, 0], [], []>} : vector<4x32xbf16>, vector<128x32xbf16>, vector<4x128xf32> -> vector<4x128xf32>
      %79 = arith.truncf %78 : vector<4x128xf32> to vector<4x128xbf16>
      %c1_82 = arith.constant 1 : index
      %c0_83 = arith.constant 0 : index
      %c0_84 = arith.constant 0 : index
      %80 = vector.load %arg8[%c1_82, %c0_83, %c0_84] : memref<8x4x128xbf16, #tpu.memory_space<vmem>>, vector<1x4x128xbf16>
      %81 = vector.shape_cast %80 : vector<1x4x128xbf16> to vector<4x128xbf16>
      %82 = vector.shape_cast %79 : vector<4x128xbf16> to vector<1x4x128xbf16>
      tpu.vector_store %arg8[%c1_82, %c0_83, %c0_84], %82 {strides = array<i32>} : memref<8x4x128xbf16, #tpu.memory_space<vmem>>, vector<1x4x128xbf16>,
      %c0_85 = arith.constant 0 : index
      %c2_86 = arith.constant 2 : index
      %c0_87 = arith.constant 0 : index
      %c0_88 = arith.constant 0 : index
      %83 = vector.load %arg6[%c0_85, %c2_86, %c0_87, %c0_88] : memref<1x8x4x32xbf16, #tpu.memory_space<vmem>>, vector<1x1x4x32xbf16>
      %84 = vector.shape_cast %83 : vector<1x1x4x32xbf16> to vector<4x32xbf16>
      %c0_89 = arith.constant 0 : index
      %c0_90 = arith.constant 0 : index
      %c0_91 = arith.constant 0 : index
      %85 = vector.load %arg4[%c0_89, %c0_90, %c0_91] : memref<1x128x32xbf16, #tpu.memory_space<vmem>>, vector<1x128x32xbf16>
      %86 = vector.shape_cast %85 : vector<1x128x32xbf16> to vector<128x32xbf16>
      %cst_92 = arith.constant dense<0.000000e+00> : vector<4x128xf32>
      %87 = tpu.matmul %84, %86, %cst_92 {dimension_numbers = #tpu.dot_dimension_numbers<[1], [1], [0], [0], [0, 0, 1, 0], [], []>} : vector<4x32xbf16>, vector<128x32xbf16>, vector<4x128xf32> -> vector<4x128xf32>
      %88 = arith.truncf %87 : vector<4x128xf32> to vector<4x128xbf16>
      %c2_93 = arith.constant 2 : index
      %c0_94 = arith.constant 0 : index
      %c0_95 = arith.constant 0 : index
      %89 = vector.load %arg8[%c2_93, %c0_94, %c0_95] : memref<8x4x128xbf16, #tpu.memory_space<vmem>>, vector<1x4x128xbf16>
      %90 = vector.shape_cast %89 : vector<1x4x128xbf16> to vector<4x128xbf16>
      %91 = vector.shape_cast %88 : vector<4x128xbf16> to vector<1x4x128xbf16>
      tpu.vector_store %arg8[%c2_93, %c0_94, %c0_95], %91 {strides = array<i32>} : memref<8x4x128xbf16, #tpu.memory_space<vmem>>, vector<1x4x128xbf16>,
      %c0_96 = arith.constant 0 : index
      %c3_97 = arith.constant 3 : index
      %c0_98 = arith.constant 0 : index
      %c0_99 = arith.constant 0 : index
      %92 = vector.load %arg6[%c0_96, %c3_97, %c0_98, %c0_99] : memref<1x8x4x32xbf16, #tpu.memory_space<vmem>>, vector<1x1x4x32xbf16>
      %93 = vector.shape_cast %92 : vector<1x1x4x32xbf16> to vector<4x32xbf16>
      %c0_100 = arith.constant 0 : index
      %c0_101 = arith.constant 0 : index
      %c0_102 = arith.constant 0 : index
      %94 = vector.load %arg4[%c0_100, %c0_101, %c0_102] : memref<1x128x32xbf16, #tpu.memory_space<vmem>>, vector<1x128x32xbf16>
      %95 = vector.shape_cast %94 : vector<1x128x32xbf16> to vector<128x32xbf16>
      %cst_103 = arith.constant dense<0.000000e+00> : vector<4x128xf32>
      %96 = tpu.matmul %93, %95, %cst_103 {dimension_numbers = #tpu.dot_dimension_numbers<[1], [1], [0], [0], [0, 0, 1, 0], [], []>} : vector<4x32xbf16>, vector<128x32xbf16>, vector<4x128xf32> -> vector<4x128xf32>
      %97 = arith.truncf %96 : vector<4x128xf32> to vector<4x128xbf16>
      %c3_104 = arith.constant 3 : index
      %c0_105 = arith.constant 0 : index
      %c0_106 = arith.constant 0 : index
      %98 = vector.load %arg8[%c3_104, %c0_105, %c0_106] : memref<8x4x128xbf16, #tpu.memory_space<vmem>>, vector<1x4x128xbf16>
      %99 = vector.shape_cast %98 : vector<1x4x128xbf16> to vector<4x128xbf16>
      %100 = vector.shape_cast %97 : vector<4x128xbf16> to vector<1x4x128xbf16>
      tpu.vector_store %arg8[%c3_104, %c0_105, %c0_106], %100 {strides = array<i32>} : memref<8x4x128xbf16, #tpu.memory_space<vmem>>, vector<1x4x128xbf16>,
      %c0_107 = arith.constant 0 : index
      %c4_108 = arith.constant 4 : index
      %c0_109 = arith.constant 0 : index
      %c0_110 = arith.constant 0 : index
      %101 = vector.load %arg6[%c0_107, %c4_108, %c0_109, %c0_110] : memref<1x8x4x32xbf16, #tpu.memory_space<vmem>>, vector<1x1x4x32xbf16>
      %102 = vector.shape_cast %101 : vector<1x1x4x32xbf16> to vector<4x32xbf16>
      %c0_111 = arith.constant 0 : index
      %c0_112 = arith.constant 0 : index
      %c0_113 = arith.constant 0 : index
      %103 = vector.load %arg4[%c0_111, %c0_112, %c0_113] : memref<1x128x32xbf16, #tpu.memory_space<vmem>>, vector<1x128x32xbf16>
      %104 = vector.shape_cast %103 : vector<1x128x32xbf16> to vector<128x32xbf16>
      %cst_114 = arith.constant dense<0.000000e+00> : vector<4x128xf32>
      %105 = tpu.matmul %102, %104, %cst_114 {dimension_numbers = #tpu.dot_dimension_numbers<[1], [1], [0], [0], [0, 0, 1, 0], [], []>} : vector<4x32xbf16>, vector<128x32xbf16>, vector<4x128xf32> -> vector<4x128xf32>
      %106 = arith.truncf %105 : vector<4x128xf32> to vector<4x128xbf16>
      %c4_115 = arith.constant 4 : index
      %c0_116 = arith.constant 0 : index
      %c0_117 = arith.constant 0 : index
      %107 = vector.load %arg8[%c4_115, %c0_116, %c0_117] : memref<8x4x128xbf16, #tpu.memory_space<vmem>>, vector<1x4x128xbf16>
      %108 = vector.shape_cast %107 : vector<1x4x128xbf16> to vector<4x128xbf16>
      %109 = vector.shape_cast %106 : vector<4x128xbf16> to vector<1x4x128xbf16>
      tpu.vector_store %arg8[%c4_115, %c0_116, %c0_117], %109 {strides = array<i32>} : memref<8x4x128xbf16, #tpu.memory_space<vmem>>, vector<1x4x128xbf16>,
      %c0_118 = arith.constant 0 : index
      %c5_119 = arith.constant 5 : index
      %c0_120 = arith.constant 0 : index
      %c0_121 = arith.constant 0 : index
      %110 = vector.load %arg6[%c0_118, %c5_119, %c0_120, %c0_121] : memref<1x8x4x32xbf16, #tpu.memory_space<vmem>>, vector<1x1x4x32xbf16>
      %111 = vector.shape_cast %110 : vector<1x1x4x32xbf16> to vector<4x32xbf16>
      %c0_122 = arith.constant 0 : index
      %c0_123 = arith.constant 0 : index
      %c0_124 = arith.constant 0 : index
      %112 = vector.load %arg4[%c0_122, %c0_123, %c0_124] : memref<1x128x32xbf16, #tpu.memory_space<vmem>>, vector<1x128x32xbf16>
      %113 = vector.shape_cast %112 : vector<1x128x32xbf16> to vector<128x32xbf16>
      %cst_125 = arith.constant dense<0.000000e+00> : vector<4x128xf32>
      %114 = tpu.matmul %111, %113, %cst_125 {dimension_numbers = #tpu.dot_dimension_numbers<[1], [1], [0], [0], [0, 0, 1, 0], [], []>} : vector<4x32xbf16>, vector<128x32xbf16>, vector<4x128xf32> -> vector<4x128xf32>
      %115 = arith.truncf %114 : vector<4x128xf32> to vector<4x128xbf16>
      %c5_126 = arith.constant 5 : index
      %c0_127 = arith.constant 0 : index
      %c0_128 = arith.constant 0 : index
      %116 = vector.load %arg8[%c5_126, %c0_127, %c0_128] : memref<8x4x128xbf16, #tpu.memory_space<vmem>>, vector<1x4x128xbf16>
      %117 = vector.shape_cast %116 : vector<1x4x128xbf16> to vector<4x128xbf16>
      %118 = vector.shape_cast %115 : vector<4x128xbf16> to vector<1x4x128xbf16>
      tpu.vector_store %arg8[%c5_126, %c0_127, %c0_128], %118 {strides = array<i32>} : memref<8x4x128xbf16, #tpu.memory_space<vmem>>, vector<1x4x128xbf16>,
      %c0_129 = arith.constant 0 : index
      %c6_130 = arith.constant 6 : index
      %c0_131 = arith.constant 0 : index
      %c0_132 = arith.constant 0 : index
      %119 = vector.load %arg6[%c0_129, %c6_130, %c0_131, %c0_132] : memref<1x8x4x32xbf16, #tpu.memory_space<vmem>>, vector<1x1x4x32xbf16>
      %120 = vector.shape_cast %119 : vector<1x1x4x32xbf16> to vector<4x32xbf16>
      %c0_133 = arith.constant 0 : index
      %c0_134 = arith.constant 0 : index
      %c0_135 = arith.constant 0 : index
      %121 = vector.load %arg4[%c0_133, %c0_134, %c0_135] : memref<1x128x32xbf16, #tpu.memory_space<vmem>>, vector<1x128x32xbf16>
      %122 = vector.shape_cast %121 : vector<1x128x32xbf16> to vector<128x32xbf16>
      %cst_136 = arith.constant dense<0.000000e+00> : vector<4x128xf32>
      %123 = tpu.matmul %120, %122, %cst_136 {dimension_numbers = #tpu.dot_dimension_numbers<[1], [1], [0], [0], [0, 0, 1, 0], [], []>} : vector<4x32xbf16>, vector<128x32xbf16>, vector<4x128xf32> -> vector<4x128xf32>
      %124 = arith.truncf %123 : vector<4x128xf32> to vector<4x128xbf16>
      %c6_137 = arith.constant 6 : index
      %c0_138 = arith.constant 0 : index
      %c0_139 = arith.constant 0 : index
      %125 = vector.load %arg8[%c6_137, %c0_138, %c0_139] : memref<8x4x128xbf16, #tpu.memory_space<vmem>>, vector<1x4x128xbf16>
      %126 = vector.shape_cast %125 : vector<1x4x128xbf16> to vector<4x128xbf16>
      %127 = vector.shape_cast %124 : vector<4x128xbf16> to vector<1x4x128xbf16>
      tpu.vector_store %arg8[%c6_137, %c0_138, %c0_139], %127 {strides = array<i32>} : memref<8x4x128xbf16, #tpu.memory_space<vmem>>, vector<1x4x128xbf16>,
      %c0_140 = arith.constant 0 : index
      %c7_141 = arith.constant 7 : index
      %c0_142 = arith.constant 0 : index
      %c0_143 = arith.constant 0 : index
      %128 = vector.load %arg6[%c0_140, %c7_141, %c0_142, %c0_143] : memref<1x8x4x32xbf16, #tpu.memory_space<vmem>>, vector<1x1x4x32xbf16>
      %129 = vector.shape_cast %128 : vector<1x1x4x32xbf16> to vector<4x32xbf16>
      %c0_144 = arith.constant 0 : index
      %c0_145 = arith.constant 0 : index
      %c0_146 = arith.constant 0 : index
      %130 = vector.load %arg4[%c0_144, %c0_145, %c0_146] : memref<1x128x32xbf16, #tpu.memory_space<vmem>>, vector<1x128x32xbf16>
      %131 = vector.shape_cast %130 : vector<1x128x32xbf16> to vector<128x32xbf16>
      %cst_147 = arith.constant dense<0.000000e+00> : vector<4x128xf32>
      %132 = tpu.matmul %129, %131, %cst_147 {dimension_numbers = #tpu.dot_dimension_numbers<[1], [1], [0], [0], [0, 0, 1, 0], [], []>} : vector<4x32xbf16>, vector<128x32xbf16>, vector<4x128xf32> -> vector<4x128xf32>
      %133 = arith.truncf %132 : vector<4x128xf32> to vector<4x128xbf16>
      %c7_148 = arith.constant 7 : index
      %c0_149 = arith.constant 0 : index
      %c0_150 = arith.constant 0 : index
      %134 = vector.load %arg8[%c7_148, %c0_149, %c0_150] : memref<8x4x128xbf16, #tpu.memory_space<vmem>>, vector<1x4x128xbf16>
      %135 = vector.shape_cast %134 : vector<1x4x128xbf16> to vector<4x128xbf16>
      %136 = vector.shape_cast %133 : vector<4x128xbf16> to vector<1x4x128xbf16>
      tpu.vector_store %arg8[%c7_148, %c0_149, %c0_150], %136 {strides = array<i32>} : memref<8x4x128xbf16, #tpu.memory_space<vmem>>, vector<1x4x128xbf16>,
    } else {
    }
    %c0 = arith.constant 0 : index
    %c0_1 = arith.constant 0 : index
    %c0_2 = arith.constant 0 : index
    %3 = vector.load %arg3[%c0, %c0_1, %c0_2] : memref<1x8x32xbf16, #tpu.memory_space<vmem>>, vector<1x8x32xbf16>
    %4 = vector.shape_cast %3 : vector<1x8x32xbf16> to vector<8x32xbf16>
    %c0_3 = arith.constant 0 : index
    %c0_4 = arith.constant 0 : index
    %c0_5 = arith.constant 0 : index
    %5 = vector.load %arg5[%c0_3, %c0_4, %c0_5] : memref<1x32x32xbf16, #tpu.memory_space<vmem>>, vector<1x32x32xbf16>
    %6 = vector.shape_cast %5 : vector<1x32x32xbf16> to vector<32x32xbf16>
    %cst = arith.constant dense<0.000000e+00> : vector<8x32xf32>
    %7 = tpu.matmul %4, %6, %cst {dimension_numbers = #tpu.dot_dimension_numbers<[1], [1], [0], [0], [0, 0, 1, 0], [], []>} : vector<8x32xbf16>, vector<32x32xbf16>, vector<8x32xf32> -> vector<8x32xf32>
    %8 = arith.truncf %7 : vector<8x32xf32> to vector<8x32xbf16>
    %9 = vector.extract_strided_slice %8 {offsets = [0, 0], sizes = [8, 4], strides = [1, 1]} : vector<8x32xbf16> to vector<8x4xbf16>
    %c0_6 = arith.constant 0 : index
    %c0_7 = arith.constant 0 : index
    %c0_8 = arith.constant 0 : index
    %10 = vector.load %arg8[%c0_6, %c0_7, %c0_8] : memref<8x4x128xbf16, #tpu.memory_space<vmem>>, vector<1x4x128xbf16>
    %11 = vector.shape_cast %10 : vector<1x4x128xbf16> to vector<4x128xbf16>
    %cst_9 = arith.constant dense<0.000000e+00> : vector<8x128xf32>
    %12 = tpu.matmul %9, %11, %cst_9 {dimension_numbers = #tpu.dot_dimension_numbers<[1], [0], [0], [1], [0, 0, 1, 1], [], []>} : vector<8x4xbf16>, vector<4x128xbf16>, vector<8x128xf32> -> vector<8x128xf32>
    %c0_10 = arith.constant 0 : index
    %c0_11 = arith.constant 0 : index
    %c0_12 = arith.constant 0 : index
    %c0_13 = arith.constant 0 : index
    %13 = vector.load %arg7[%c0_10, %c0_11, %c0_12, %c0_13] : memref<1x8x8x128xf32, #tpu.memory_space<vmem>>, vector<1x1x8x128xf32>
    %14 = vector.shape_cast %13 : vector<1x1x8x128xf32> to vector<8x128xf32>
    %15 = vector.shape_cast %12 : vector<8x128xf32> to vector<1x1x8x128xf32>
    tpu.vector_store %arg7[%c0_10, %c0_11, %c0_12, %c0_13], %15 {strides = array<i32>} : memref<1x8x8x128xf32, #tpu.memory_space<vmem>>, vector<1x1x8x128xf32>,
    %16 = vector.extract_strided_slice %8 {offsets = [0, 4], sizes = [8, 4], strides = [1, 1]} : vector<8x32xbf16> to vector<8x4xbf16>
    %c1 = arith.constant 1 : index
    %c0_14 = arith.constant 0 : index
    %c0_15 = arith.constant 0 : index
    %17 = vector.load %arg8[%c1, %c0_14, %c0_15] : memref<8x4x128xbf16, #tpu.memory_space<vmem>>, vector<1x4x128xbf16>
    %18 = vector.shape_cast %17 : vector<1x4x128xbf16> to vector<4x128xbf16>
    %cst_16 = arith.constant dense<0.000000e+00> : vector<8x128xf32>
    %19 = tpu.matmul %16, %18, %cst_16 {dimension_numbers = #tpu.dot_dimension_numbers<[1], [0], [0], [1], [0, 0, 1, 1], [], []>} : vector<8x4xbf16>, vector<4x128xbf16>, vector<8x128xf32> -> vector<8x128xf32>
    %c0_17 = arith.constant 0 : index
    %c1_18 = arith.constant 1 : index
    %c0_19 = arith.constant 0 : index
    %c0_20 = arith.constant 0 : index
    %20 = vector.load %arg7[%c0_17, %c1_18, %c0_19, %c0_20] : memref<1x8x8x128xf32, #tpu.memory_space<vmem>>, vector<1x1x8x128xf32>
    %21 = vector.shape_cast %20 : vector<1x1x8x128xf32> to vector<8x128xf32>
    %22 = vector.shape_cast %19 : vector<8x128xf32> to vector<1x1x8x128xf32>
    tpu.vector_store %arg7[%c0_17, %c1_18, %c0_19, %c0_20], %22 {strides = array<i32>} : memref<1x8x8x128xf32, #tpu.memory_space<vmem>>, vector<1x1x8x128xf32>,
    %23 = vector.extract_strided_slice %8 {offsets = [0, 8], sizes = [8, 4], strides = [1, 1]} : vector<8x32xbf16> to vector<8x4xbf16>
    %c2 = arith.constant 2 : index
    %c0_21 = arith.constant 0 : index
    %c0_22 = arith.constant 0 : index
    %24 = vector.load %arg8[%c2, %c0_21, %c0_22] : memref<8x4x128xbf16, #tpu.memory_space<vmem>>, vector<1x4x128xbf16>
    %25 = vector.shape_cast %24 : vector<1x4x128xbf16> to vector<4x128xbf16>
    %cst_23 = arith.constant dense<0.000000e+00> : vector<8x128xf32>
    %26 = tpu.matmul %23, %25, %cst_23 {dimension_numbers = #tpu.dot_dimension_numbers<[1], [0], [0], [1], [0, 0, 1, 1], [], []>} : vector<8x4xbf16>, vector<4x128xbf16>, vector<8x128xf32> -> vector<8x128xf32>
    %c0_24 = arith.constant 0 : index
    %c2_25 = arith.constant 2 : index
    %c0_26 = arith.constant 0 : index
    %c0_27 = arith.constant 0 : index
    %27 = vector.load %arg7[%c0_24, %c2_25, %c0_26, %c0_27] : memref<1x8x8x128xf32, #tpu.memory_space<vmem>>, vector<1x1x8x128xf32>
    %28 = vector.shape_cast %27 : vector<1x1x8x128xf32> to vector<8x128xf32>
    %29 = vector.shape_cast %26 : vector<8x128xf32> to vector<1x1x8x128xf32>
    tpu.vector_store %arg7[%c0_24, %c2_25, %c0_26, %c0_27], %29 {strides = array<i32>} : memref<1x8x8x128xf32, #tpu.memory_space<vmem>>, vector<1x1x8x128xf32>,
    %30 = vector.extract_strided_slice %8 {offsets = [0, 12], sizes = [8, 4], strides = [1, 1]} : vector<8x32xbf16> to vector<8x4xbf16>
    %c3 = arith.constant 3 : index
    %c0_28 = arith.constant 0 : index
    %c0_29 = arith.constant 0 : index
    %31 = vector.load %arg8[%c3, %c0_28, %c0_29] : memref<8x4x128xbf16, #tpu.memory_space<vmem>>, vector<1x4x128xbf16>
    %32 = vector.shape_cast %31 : vector<1x4x128xbf16> to vector<4x128xbf16>
    %cst_30 = arith.constant dense<0.000000e+00> : vector<8x128xf32>
    %33 = tpu.matmul %30, %32, %cst_30 {dimension_numbers = #tpu.dot_dimension_numbers<[1], [0], [0], [1], [0, 0, 1, 1], [], []>} : vector<8x4xbf16>, vector<4x128xbf16>, vector<8x128xf32> -> vector<8x128xf32>
    %c0_31 = arith.constant 0 : index
    %c3_32 = arith.constant 3 : index
    %c0_33 = arith.constant 0 : index
    %c0_34 = arith.constant 0 : index
    %34 = vector.load %arg7[%c0_31, %c3_32, %c0_33, %c0_34] : memref<1x8x8x128xf32, #tpu.memory_space<vmem>>, vector<1x1x8x128xf32>
    %35 = vector.shape_cast %34 : vector<1x1x8x128xf32> to vector<8x128xf32>
    %36 = vector.shape_cast %33 : vector<8x128xf32> to vector<1x1x8x128xf32>
    tpu.vector_store %arg7[%c0_31, %c3_32, %c0_33, %c0_34], %36 {strides = array<i32>} : memref<1x8x8x128xf32, #tpu.memory_space<vmem>>, vector<1x1x8x128xf32>,
    %37 = vector.extract_strided_slice %8 {offsets = [0, 16], sizes = [8, 4], strides = [1, 1]} : vector<8x32xbf16> to vector<8x4xbf16>
    %c4 = arith.constant 4 : index
    %c0_35 = arith.constant 0 : index
    %c0_36 = arith.constant 0 : index
    %38 = vector.load %arg8[%c4, %c0_35, %c0_36] : memref<8x4x128xbf16, #tpu.memory_space<vmem>>, vector<1x4x128xbf16>
    %39 = vector.shape_cast %38 : vector<1x4x128xbf16> to vector<4x128xbf16>
    %cst_37 = arith.constant dense<0.000000e+00> : vector<8x128xf32>
    %40 = tpu.matmul %37, %39, %cst_37 {dimension_numbers = #tpu.dot_dimension_numbers<[1], [0], [0], [1], [0, 0, 1, 1], [], []>} : vector<8x4xbf16>, vector<4x128xbf16>, vector<8x128xf32> -> vector<8x128xf32>
    %c0_38 = arith.constant 0 : index
    %c4_39 = arith.constant 4 : index
    %c0_40 = arith.constant 0 : index
    %c0_41 = arith.constant 0 : index
    %41 = vector.load %arg7[%c0_38, %c4_39, %c0_40, %c0_41] : memref<1x8x8x128xf32, #tpu.memory_space<vmem>>, vector<1x1x8x128xf32>
    %42 = vector.shape_cast %41 : vector<1x1x8x128xf32> to vector<8x128xf32>
    %43 = vector.shape_cast %40 : vector<8x128xf32> to vector<1x1x8x128xf32>
    tpu.vector_store %arg7[%c0_38, %c4_39, %c0_40, %c0_41], %43 {strides = array<i32>} : memref<1x8x8x128xf32, #tpu.memory_space<vmem>>, vector<1x1x8x128xf32>,
    %44 = vector.extract_strided_slice %8 {offsets = [0, 20], sizes = [8, 4], strides = [1, 1]} : vector<8x32xbf16> to vector<8x4xbf16>
    %c5 = arith.constant 5 : index
    %c0_42 = arith.constant 0 : index
    %c0_43 = arith.constant 0 : index
    %45 = vector.load %arg8[%c5, %c0_42, %c0_43] : memref<8x4x128xbf16, #tpu.memory_space<vmem>>, vector<1x4x128xbf16>
    %46 = vector.shape_cast %45 : vector<1x4x128xbf16> to vector<4x128xbf16>
    %cst_44 = arith.constant dense<0.000000e+00> : vector<8x128xf32>
    %47 = tpu.matmul %44, %46, %cst_44 {dimension_numbers = #tpu.dot_dimension_numbers<[1], [0], [0], [1], [0, 0, 1, 1], [], []>} : vector<8x4xbf16>, vector<4x128xbf16>, vector<8x128xf32> -> vector<8x128xf32>
    %c0_45 = arith.constant 0 : index
    %c5_46 = arith.constant 5 : index
    %c0_47 = arith.constant 0 : index
    %c0_48 = arith.constant 0 : index
    %48 = vector.load %arg7[%c0_45, %c5_46, %c0_47, %c0_48] : memref<1x8x8x128xf32, #tpu.memory_space<vmem>>, vector<1x1x8x128xf32>
    %49 = vector.shape_cast %48 : vector<1x1x8x128xf32> to vector<8x128xf32>
    %50 = vector.shape_cast %47 : vector<8x128xf32> to vector<1x1x8x128xf32>
    tpu.vector_store %arg7[%c0_45, %c5_46, %c0_47, %c0_48], %50 {strides = array<i32>} : memref<1x8x8x128xf32, #tpu.memory_space<vmem>>, vector<1x1x8x128xf32>,
    %51 = vector.extract_strided_slice %8 {offsets = [0, 24], sizes = [8, 4], strides = [1, 1]} : vector<8x32xbf16> to vector<8x4xbf16>
    %c6 = arith.constant 6 : index
    %c0_49 = arith.constant 0 : index
    %c0_50 = arith.constant 0 : index
    %52 = vector.load %arg8[%c6, %c0_49, %c0_50] : memref<8x4x128xbf16, #tpu.memory_space<vmem>>, vector<1x4x128xbf16>
    %53 = vector.shape_cast %52 : vector<1x4x128xbf16> to vector<4x128xbf16>
    %cst_51 = arith.constant dense<0.000000e+00> : vector<8x128xf32>
    %54 = tpu.matmul %51, %53, %cst_51 {dimension_numbers = #tpu.dot_dimension_numbers<[1], [0], [0], [1], [0, 0, 1, 1], [], []>} : vector<8x4xbf16>, vector<4x128xbf16>, vector<8x128xf32> -> vector<8x128xf32>
    %c0_52 = arith.constant 0 : index
    %c6_53 = arith.constant 6 : index
    %c0_54 = arith.constant 0 : index
    %c0_55 = arith.constant 0 : index
    %55 = vector.load %arg7[%c0_52, %c6_53, %c0_54, %c0_55] : memref<1x8x8x128xf32, #tpu.memory_space<vmem>>, vector<1x1x8x128xf32>
    %56 = vector.shape_cast %55 : vector<1x1x8x128xf32> to vector<8x128xf32>
    %57 = vector.shape_cast %54 : vector<8x128xf32> to vector<1x1x8x128xf32>
    tpu.vector_store %arg7[%c0_52, %c6_53, %c0_54, %c0_55], %57 {strides = array<i32>} : memref<1x8x8x128xf32, #tpu.memory_space<vmem>>, vector<1x1x8x128xf32>,
    %58 = vector.extract_strided_slice %8 {offsets = [0, 28], sizes = [8, 4], strides = [1, 1]} : vector<8x32xbf16> to vector<8x4xbf16>
    %c7 = arith.constant 7 : index
    %c0_56 = arith.constant 0 : index
    %c0_57 = arith.constant 0 : index
    %59 = vector.load %arg8[%c7, %c0_56, %c0_57] : memref<8x4x128xbf16, #tpu.memory_space<vmem>>, vector<1x4x128xbf16>
    %60 = vector.shape_cast %59 : vector<1x4x128xbf16> to vector<4x128xbf16>
    %cst_58 = arith.constant dense<0.000000e+00> : vector<8x128xf32>
    %61 = tpu.matmul %58, %60, %cst_58 {dimension_numbers = #tpu.dot_dimension_numbers<[1], [0], [0], [1], [0, 0, 1, 1], [], []>} : vector<8x4xbf16>, vector<4x128xbf16>, vector<8x128xf32> -> vector<8x128xf32>
    %c0_59 = arith.constant 0 : index
    %c7_60 = arith.constant 7 : index
    %c0_61 = arith.constant 0 : index
    %c0_62 = arith.constant 0 : index
    %62 = vector.load %arg7[%c0_59, %c7_60, %c0_61, %c0_62] : memref<1x8x8x128xf32, #tpu.memory_space<vmem>>, vector<1x1x8x128xf32>
    %63 = vector.shape_cast %62 : vector<1x1x8x128xf32> to vector<8x128xf32>
    %64 = vector.shape_cast %61 : vector<8x128xf32> to vector<1x1x8x128xf32>
    tpu.vector_store %arg7[%c0_59, %c7_60, %c0_61, %c0_62], %64 {strides = array<i32>} : memref<1x8x8x128xf32, #tpu.memory_space<vmem>>, vector<1x1x8x128xf32>,
    return
  }
  func.func @transform_0(%arg0: i32, %arg1: i32, %arg2: i32) -> (i32, i32, i32) {
    %c0_i32 = arith.constant 0 : i32
    %c0_i32_0 = arith.constant 0 : i32
    return %arg0, %arg2, %c0_i32 : i32, i32, i32
  }
  func.func @transform_1(%arg0: i32, %arg1: i32, %arg2: i32) -> (i32, i32, i32) {
    %c0_i32 = arith.constant 0 : i32
    %c0_i32_0 = arith.constant 0 : i32
    %c0_i32_1 = arith.constant 0 : i32
    return %arg0, %c0_i32, %c0_i32_0 : i32, i32, i32
  }
  func.func @transform_2(%arg0: i32, %arg1: i32, %arg2: i32) -> (i32, i32, i32) {
    %c0_i32 = arith.constant 0 : i32
    %c0_i32_0 = arith.constant 0 : i32
    %c0_i32_1 = arith.constant 0 : i32
    return %arg1, %c0_i32, %c0_i32_0 : i32, i32, i32
  }
  func.func @transform_3(%arg0: i32, %arg1: i32, %arg2: i32) -> (i32, i32, i32, i32) {
    %c0_i32 = arith.constant 0 : i32
    %c0_i32_0 = arith.constant 0 : i32
    %c0_i32_1 = arith.constant 0 : i32
    %c0_i32_2 = arith.constant 0 : i32
    return %arg1, %c0_i32, %c0_i32_0, %c0_i32_1 : i32, i32, i32, i32
  }
  func.func @transform_4(%arg0: i32, %arg1: i32, %arg2: i32) -> (i32, i32, i32, i32) {
    %c0_i32 = arith.constant 0 : i32
    %c0_i32_0 = arith.constant 0 : i32
    return %arg0, %arg1, %arg2, %c0_i32 : i32, i32, i32, i32
  }
}

</mosaic_0001>

<bundles_post_ra>
// kernel: tpu_custom_call.1
= control target key start
LH: loop header
LB: loop body
LE: loop exit
PB: predicated region body
PF: predicated region fallthrough
CT: control target
= control target key end

     0   :  { %9 = vsyncpa [#allocation4], 0  ;;  %s3039_s0 = inlined_call_operand.vmem [shape: bf16[2,8,32], index: 0, kind: input, shape index: {}]   ;;  %s3040_s1 = inlined_call_operand.vmem [shape: bf16[2,128,32], index: 1, kind: input, shape index: {}]   ;;  %s3041_s2 = inlined_call_operand.vmem [shape: bf16[1,32,32], index: 2, kind: input, shape index: {}]   ;;  %s3042_s3 = inlined_call_operand.vmem [shape: bf16[1,8,4,32], index: 3, kind: input, shape index: {}]   ;;  %s3043_s4 = inlined_call_operand.hbm [shape: f32[2,8,8,128], index: 4, kind: output, shape index: {}]  }
   0x1   :  { %11 = vsyncpa [#allocation4 + $0x1], 0  ;;  %s2607_s15 = smov 0   ;;  %s2609_s16 = smov 0  }
   0x2   :  { %s2611_s17 = smov 0   ;;  %s2613_s18 = smov 0  }
   0x3   :  { %s2615_s19 = smov 0   ;;  %s2617_s20 = smov 0  }
   0x4 LB: > { %s1936_s21 = sadd.s32 4294967295, %s2568_s20   ;;  %s1937_s22 = sadd.s32 4294967294, %s2568_s20   ;;  %s2568_s20 = sphi %s2617_s20, %s17_s20   ;;  %s2564_s19 = sphi %s2615_s19, %s3050_s19   ;;  %s2560_s18 = sphi %s2613_s18, %s3049_s18   ;;  %s2556_s17 = sphi %s2611_s17, %s3048_s17   ;;  %s2552_s16 = sphi %s2609_s16, %s3047_s16   ;;  %s2548_s15 = sphi %s2607_s15, %s3046_s15  }
   0x5   : > { %s36_s23 = sadd.s32 1, %s2564_s19  ;;  %s153_s24 = sadd.s32 1, %s2556_s17 }
   0x6   : > { %p38_p0 = scmp.ge.s32.totalorder %s36_s23, 2  ;;  %p163_p1 = scmp.ne.s32.totalorder %s2556_s17, %s2552_s16 }
   0x7   : > { %p164_p2 = scmp.eq.s32.totalorder %s1936_s21, 1  ;;  %p169_p3 = scmp.ne.s32.totalorder %s2552_s16, %s2548_s15 }
   0x8   : > { %s3052_s23 = smov (%p38_p0, %s36_s23), 0  ;;  %p170_p5 = scmp.eq.s32.totalorder %s1937_s22, 1 }
   0x9   : > { %p2647_p4 = por %p164_p2, %p163_p1  ;;  %s146_s26 = ssub.s32 %s2564_s19, %s3052_s23 }
   0xa   : > { %p1942_p6 = scmp.ge.s32.totalorder %s2568_s20, 1  ;;  %p151_p7 = scmp.eq.s32.totalorder %s146_s26, 0 }
   0xb   : > { %p2654_p8 = por %p170_p5, %p169_p3  ;;  %p222_p9 = scmp.lt.s32.totalorder %s2568_s20, 3 }
   0xc   : > { %s2660_s28 = scalar_select %p151_p7, %s2556_s17, %s153_s24  }
   0xd   : > { %p223_p10 = pnand %p1942_p6, %p222_p9 }
   0xe   : > { %p265_p11 = scmp.lt.s32.totalorder (!%p223_p10), %s2560_s18, 1  ;;  %v2570_v0 = vmov (!%p223_p10), 0.0   ;;  %vm2571_vm0 = vmmov (!%p223_p10), 0   ;;  %vm350_vm1 = vcmask (!%p223_p10), 261120   ;;  %v293_v34 = vld [vmem:[%s3042_s3] sm:$0x3] (!%p223_p10) }
   0xf   : > { %226 = sbr.rel (%p223_p10) target bundleno = 880 (0x370), region = 36  ;;  %2142 = vmatprep.subr.bf16.mxu0 (!%p223_p10), %v2570_v0  ;;  %2162 = vmatprep.subr.bf16.mxu1 (!%p223_p10), %v2570_v0  ;;  %v1956_v37 = vld [vmem:[%s3042_s3 + $0x2] sm:$0x3] (!%p223_p10)  ;;  %vm1387_vm2 = vcmask (!%p223_p10), 1041408   ;;  %vm1383_vm3 = vcmask (!%p223_p10), 31744   ;;  %s2573_s24 = smov (!%p223_p10), 124  }
  0x10   : > { %2158 = vmatprep.mubr.msk.bf16.mxu0 (!%p223_p10), %vm2571_vm0, %v2570_v0  ;;  %2178 = vmatprep.mubr.msk.bf16.mxu1 (!%p223_p10), %vm2571_vm0, %v2570_v0  ;;  %s2574_s26 = smov (!%p223_p10), 112   ;;  %s2576_s5 = smov (!%p223_p10), 104  }
  0x11   : > { %s2577_s6 = smov (!%p223_p10), 108   ;;  %s2578_s8 = smov (!%p223_p10), 100  }
  0x12   : > { %s262_s9 = sand.u32 (!%p223_p10), 1, %s2552_s16   ;;  %s2050_s12 = sshll.u32 (!%p223_p10), %s2560_s18, 10 }
  0x13   : > { %s2988_s21 = scalar_lea.hbm (!%p223_p10), %s3043_s4, %s2050_s12 }
  0x16   : > { %s2666_s29 = scalar_select %p265_p11, %s2560_s18, 1 }
  0x17   : > { %s2993_s18 = scalar_lea.sflag [#allocation4], %s262_s9 }
  0x18   : > { %s2049_s30 = sshll.u32 %s2666_s29, 6  ;;  %s1944_s13 = sshll.u32 %s2666_s29, 2 }
  0x19   : > { %s2676_s7 = scalar_lea.vmem %s3040_s1, %s2049_s30  ;;  %s271_s22 = scalar_lea.vmem %s3039_s0, %s1944_s13 }
  0x1a   : > { %v2424_v1 = vld [vmem:[%s2676_s7] sm:$0xff]   ;;  %v2425_v3 = vld [vmem:[%s2676_s7 + $0x8] sm:$0xff]   ;;  %v2426_v8 = vld [vmem:[%s2676_s7 + $0x10] sm:$0xff]   ;;  %s2572_s29 = smov 116   ;;  %s2575_s30 = smov 120  }
  0x1b   : > { %v355_v2 = vsel %vm350_vm1, %v2424_v1, 0  ;;  %v2428_v4 = vld [vmem:[%s2676_s7] sm:$0xff]   ;;  %v358_v6 = vsel %vm350_vm1, %v2425_v3, 0  ;;  %v2430_v7 = vld [vmem:[%s2676_s7 + $0x8] sm:$0xff]   ;;  %v361_v10 = vsel %vm350_vm1, %v2426_v8, 0  ;;  %v2432_v11 = vld [vmem:[%s2676_s7 + $0x10] sm:$0xff]  }
  0x1c   : > { %2143 = vmatpush3.bf16.xpose.msra.mxu0 %v355_v2  ;;  %v482_v5 = vsel %vm350_vm1, %v2428_v4, 0  ;;  %v485_v9 = vsel %vm350_vm1, %v2430_v7, 0  ;;  %v2427_v12 = vld [vmem:[%s2676_s7 + $0x18] sm:$0xff]   ;;  %v488_v13 = vsel %vm350_vm1, %v2432_v11, 0  ;;  %v2429_v16 = vld [vmem:[%s2676_s7 + $0x20] sm:$0xff]   ;;  %v2431_v20 = vld [vmem:[%s2676_s7 + $0x28] sm:$0xff]  }
  0x1d   : > { %2144 = vmatprep.subr.bf16.mxu0 %v2570_v0  ;;  %2163 = vmatpush3.bf16.xpose.msra.mxu1 %v482_v5  ;;  %v364_v14 = vsel %vm350_vm1, %v2427_v12, 0  ;;  %v2434_v15 = vld [vmem:[%s2676_s7 + $0x18] sm:$0xff]   ;;  %v367_v18 = vsel %vm350_vm1, %v2429_v16, 0  ;;  %v2436_v19 = vld [vmem:[%s2676_s7 + $0x20] sm:$0xff]   ;;  %v370_v22 = vsel %vm350_vm1, %v2431_v20, 0  ;;  %v2438_v23 = vld [vmem:[%s2676_s7 + $0x28] sm:$0xff]  }
  0x1e   : > { %2164 = vmatprep.subr.bf16.mxu1 %v2570_v0  ;;  %v491_v17 = vsel %vm350_vm1, %v2434_v15, 0  ;;  %v494_v21 = vsel %vm350_vm1, %v2436_v19, 0  ;;  %v2433_v24 = vld [vmem:[%s2676_s7 + $0x30] sm:$0xff]   ;;  %v497_v25 = vsel %vm350_vm1, %v2438_v23, 0  ;;  %v2435_v28 = vld [vmem:[%s2676_s7 + $0x38] sm:$0xff]   ;;  %v2437_v32 = vld [vmem:[%s2676_s7] sm:$0xff]  }
  0x1f   : > { %v373_v26 = vsel %vm350_vm1, %v2433_v24, 0  ;;  %v2440_v27 = vld [vmem:[%s2676_s7 + $0x30] sm:$0xff]   ;;  %v376_v30 = vsel %vm350_vm1, %v2435_v28, 0  ;;  %v2442_v31 = vld [vmem:[%s2676_s7 + $0x38] sm:$0xff]   ;;  %v610_v35 = vsel %vm350_vm1, %v2437_v32, 0  ;;  %v2444_v36 = vld [vmem:[%s2676_s7] sm:$0xff]  }
  0x20   : > { %v500_v29 = vsel %vm350_vm1, %v2440_v27, 0  ;;  %v503_v33 = vsel %vm350_vm1, %v2442_v31, 0  ;;  %v2439_v38 = vld [vmem:[%s2676_s7 + $0x8] sm:$0xff]   ;;  %v738_v39 = vsel %vm350_vm1, %v2444_v36, 0  ;;  %v2441_v42 = vld [vmem:[%s2676_s7 + $0x10] sm:$0xff]   ;;  %v2443_v46 = vld [vmem:[%s2676_s7 + $0x18] sm:$0xff]  }
  0x21   : > { %v613_v40 = vsel %vm350_vm1, %v2439_v38, 0  ;;  %v2446_v41 = vld [vmem:[%s2676_s7 + $0x8] sm:$0xff]   ;;  %v616_v44 = vsel %vm350_vm1, %v2441_v42, 0  ;;  %v2448_v45 = vld [vmem:[%s2676_s7 + $0x10] sm:$0xff]   ;;  %v619_v48 = vsel %vm350_vm1, %v2443_v46, 0  ;;  %v2450_v49 = vld [vmem:[%s2676_s7 + $0x18] sm:$0xff]  }
  0x22   : > { %v741_v43 = vsel %vm350_vm1, %v2446_v41, 0  ;;  %v744_v47 = vsel %vm350_vm1, %v2448_v45, 0  ;;  %v2445_v50 = vld [vmem:[%s2676_s7 + $0x20] sm:$0xff]   ;;  %v747_v51 = vsel %vm350_vm1, %v2450_v49, 0  ;;  %v2447_v54 = vld [vmem:[%s2676_s7 + $0x28] sm:$0xff]   ;;  %v2449_v58 = vld [vmem:[%s2676_s7 + $0x30] sm:$0xff]  }
  0x23   : > { %v622_v52 = vsel %vm350_vm1, %v2445_v50, 0  ;;  %v2452_v53 = vld [vmem:[%s2676_s7 + $0x20] sm:$0xff]   ;;  %v625_v56 = vsel %vm350_vm1, %v2447_v54, 0  ;;  %v2454_v57 = vld [vmem:[%s2676_s7 + $0x28] sm:$0xff]   ;;  %v628_v60 = vsel %vm350_vm1, %v2449_v58, 0  ;;  %v2456_v61 = vld [vmem:[%s2676_s7 + $0x30] sm:$0xff]  }
  0x24   : > { %2145 = vmatpush3.bf16.xpose.msra.mxu0 %v358_v6  ;;  %v750_v55 = vsel %vm350_vm1, %v2452_v53, 0  ;;  %v753_v59 = vsel %vm350_vm1, %v2454_v57, 0  ;;  %v2451_v62 = vld [vmem:[%s2676_s7 + $0x38] sm:$0xff]   ;;  %v756_v63 = vsel %vm350_vm1, %v2456_v61, 0  ;;  %v2453_v3 = vld [vmem:[%s2676_s7] sm:$0xff]   ;;  %v2462_v12 = vld [vmem:[%s2676_s7 + $0x8] sm:$0xff]  }
  0x25   : > { %2146 = vmatprep.subr.bf16.mxu0 %v2570_v0  ;;  %2165 = vmatpush3.bf16.xpose.msra.mxu1 %v485_v9  ;;  %v631_v1 = vsel %vm350_vm1, %v2451_v62, 0  ;;  %v2458_v2 = vld [vmem:[%s2676_s7 + $0x38] sm:$0xff]   ;;  %v1966_v5 = vld [vmem:[%s3042_s3 + $0x4] sm:$0x3]  ;;  %v866_v6 = vsel %vm350_vm1, %v2453_v3, 0  ;;  %v2455_v9 = vld [vmem:[%s2676_s7 + $0x8] sm:$0xff]  }
  0x26   : > { %2166 = vmatprep.subr.bf16.mxu1 %v2570_v0  ;;  %v759_v4 = vsel %vm350_vm1, %v2458_v2, 0  ;;  %v2460_v7 = vld [vmem:[%s2676_s7] sm:$0xff]   ;;  %v869_v11 = vsel %vm350_vm1, %v2455_v9, 0  ;;  %v2464_v16 = vld [vmem:[%s2676_s7 + $0x10] sm:$0xff]   ;;  %v2466_v20 = vld [vmem:[%s2676_s7 + $0x18] sm:$0xff]  }
  0x27   : > { %v1976_v8 = vld [vmem:[%s3042_s3 + $0x6] sm:$0x3]  ;;  %v2470_v28 = vld [vmem:[%s2676_s7 + $0x28] sm:$0xff]   ;;  %v2472_v32 = vld [vmem:[%s2676_s7 + $0x30] sm:$0xff]  }
  0x28   : > { %v2468_v24 = vld [vmem:[%s2676_s7 + $0x20] sm:$0xff]   ;;  %v2474_v36 = vld [vmem:[%s2676_s7 + $0x38] sm:$0xff]   ;;  %v1996_v42 = vld [vmem:[%s3042_s3 + $0xa] sm:$0x3] }
  0x29   : > { %v1015_v38 = vsel %vm350_vm1, %v2474_v36, 0  ;;  %v2476_v41 = vld [vmem:[%s2676_s7] sm:$0xff]   ;;  %v2478_v46 = vld [vmem:[%s2676_s7 + $0x8] sm:$0xff]   ;;  %v2480_v50 = vld [vmem:[%s2676_s7 + $0x10] sm:$0xff]  }
  0x2a   : > { %v2482_v54 = vld [vmem:[%s2676_s7 + $0x18] sm:$0xff]   ;;  %v2484_v58 = vld [vmem:[%s2676_s7 + $0x20] sm:$0xff]   ;;  %v2486_v62 = vld [vmem:[%s2676_s7 + $0x28] sm:$0xff]  }
  0x2b   : > { %v2488_v3 = vld [vmem:[%s2676_s7 + $0x30] sm:$0xff]  }
  0x2c   : > { %2147 = vmatpush3.bf16.xpose.msra.mxu0 %v361_v10  ;;  %v994_v10 = vsel %vm350_vm1, %v2460_v7, 0  ;;  %v2489_v7 = vld [vmem:[%s2676_s7 + $0x38] sm:$0xff]  }
  0x2d   : > { %2148 = vmatprep.subr.bf16.mxu0 %v2570_v0  ;;  %2167 = vmatpush3.bf16.xpose.msra.mxu1 %v488_v13  ;;  %v2457_v13 = vld [vmem:[%s2676_s7 + $0x10] sm:$0xff]   ;;  %v1271_v9 = vsel %vm350_vm1, %v2489_v7, 0 }
  0x2e   : > { %2168 = vmatprep.subr.bf16.mxu1 %v2570_v0  ;;  %v872_v15 = vsel %vm350_vm1, %v2457_v13, 0  ;;  %v2487_v13 = vld [vmem:[%s3041_s2 + $0x8] sm:$0xff]  }
  0x34   : > { %2149 = vmatpush3.bf16.xpose.msra.mxu0 %v364_v14  ;;  %v997_v14 = vsel %vm350_vm1, %v2462_v12, 0  ;;  %v2016_v12 = vld [vmem:[%s3042_s3 + $0xe] sm:$0x3] }
  0x35   : > { %2150 = vmatprep.subr.bf16.mxu0 %v2570_v0  ;;  %2169 = vmatpush3.bf16.xpose.msra.mxu1 %v491_v17  ;;  %v2459_v17 = vld [vmem:[%s2676_s7 + $0x18] sm:$0xff]  }
  0x36   : > { %2170 = vmatprep.subr.bf16.mxu1 %v2570_v0  ;;  %v875_v19 = vsel %vm350_vm1, %v2459_v17, 0 }
  0x3c   : > { %2151 = vmatpush3.bf16.xpose.msra.mxu0 %v367_v18  ;;  %v1000_v18 = vsel %vm350_vm1, %v2464_v16, 0 }
  0x3d   : > { %2152 = vmatprep.subr.bf16.mxu0 %v2570_v0  ;;  %2171 = vmatpush3.bf16.xpose.msra.mxu1 %v494_v21  ;;  %v2461_v21 = vld [vmem:[%s2676_s7 + $0x20] sm:$0xff]  }
  0x3e   : > { %2172 = vmatprep.subr.bf16.mxu1 %v2570_v0  ;;  %v878_v23 = vsel %vm350_vm1, %v2461_v21, 0 }
  0x44   : > { %2153 = vmatpush3.bf16.xpose.msra.mxu0 %v370_v22  ;;  %v1003_v22 = vsel %vm350_vm1, %v2466_v20, 0 }
  0x45   : > { %2154 = vmatprep.subr.bf16.mxu0 %v2570_v0  ;;  %2173 = vmatpush3.bf16.xpose.msra.mxu1 %v497_v25  ;;  %v2463_v25 = vld [vmem:[%s2676_s7 + $0x28] sm:$0xff]  }
  0x46   : > { %2174 = vmatprep.subr.bf16.mxu1 %v2570_v0  ;;  %v881_v27 = vsel %vm350_vm1, %v2463_v25, 0 }
  0x4c   : > { %2155 = vmatpush3.bf16.xpose.msra.mxu0 %v373_v26  ;;  %v1006_v26 = vsel %vm350_vm1, %v2468_v24, 0 }
  0x4d   : > { %2156 = vmatprep.subr.bf16.mxu0 %v2570_v0  ;;  %2175 = vmatpush3.bf16.xpose.msra.mxu1 %v500_v29  ;;  %v2465_v29 = vld [vmem:[%s2676_s7 + $0x30] sm:$0xff]  }
  0x4e   : > { %2176 = vmatprep.subr.bf16.mxu1 %v2570_v0  ;;  %v884_v31 = vsel %vm350_vm1, %v2465_v29, 0 }
  0x54   : > { %2157 = vmatpush3.bf16.xpose.msra.mxu0 %v376_v30  ;;  %v1009_v30 = vsel %vm350_vm1, %v2470_v28, 0 }
  0x55   : > { %2182 = vmatprep.subr.bf16.mxu0 %v2570_v0  ;;  %2177 = vmatpush3.bf16.xpose.msra.mxu1 %v503_v33  ;;  %v2467_v33 = vld [vmem:[%s2676_s7 + $0x38] sm:$0xff]  }
  0x56   : > { %2202 = vmatprep.subr.bf16.mxu1 %v2570_v0 }
  0x5b   : > { %2159 = vmatmul.mubr.msk.bf16.vlgmr.msra.gmra.mrb[0].mxu0 %vm350_vm1, %v293_v34  ;;  %v1012_v34 = vsel %vm350_vm1, %v2472_v32, 0 }
  0x5c   : > { %2183 = vmatpush3.bf16.xpose.msra.mxu0 %v610_v35  ;;  %2198 = vmatprep.mubr.msk.bf16.mxu0 %vm2571_vm0, %v2570_v0  ;;  %v887_v35 = vsel %vm350_vm1, %v2467_v33, 0 }
  0x5d   : > { %2184 = vmatprep.subr.bf16.mxu0 %v2570_v0  ;;  %2179 = vmatmul.mubr.msk.bf16.vlgmr.msra.gmra.mrb[0].mxu1 %vm350_vm1, %v1956_v37  ;;  %v2469_v37 = vld [vmem:[%s2676_s7] sm:$0xff]  }
  0x5e   : > { %2203 = vmatpush3.bf16.xpose.msra.mxu1 %v738_v39  ;;  %2218 = vmatprep.mubr.msk.bf16.mxu1 %vm2571_vm0, %v2570_v0  ;;  %v1986_v39 = vld [vmem:[%s3042_s3 + $0x8] sm:$0x3] }
  0x5f   : > { %2204 = vmatprep.subr.bf16.mxu1 %v2570_v0 }
  0x64   : > { %2185 = vmatpush3.bf16.xpose.msra.mxu0 %v613_v40  ;;  %v1122_v40 = vsel %vm350_vm1, %v2469_v37, 0 }
  0x65   : > { %2186 = vmatprep.subr.bf16.mxu0 %v2570_v0 }
  0x66   : > { %2205 = vmatpush3.bf16.xpose.msra.mxu1 %v741_v43  ;;  %v2471_v43 = vld [vmem:[%s2676_s7 + $0x8] sm:$0xff]  }
  0x67   : > { %2206 = vmatprep.subr.bf16.mxu1 %v2570_v0  ;;  %v1125_v45 = vsel %vm350_vm1, %v2471_v43, 0 }
  0x6c   : > { %2187 = vmatpush3.bf16.xpose.msra.mxu0 %v616_v44  ;;  %v1250_v44 = vsel %vm350_vm1, %v2476_v41, 0 }
  0x6d   : > { %2188 = vmatprep.subr.bf16.mxu0 %v2570_v0 }
  0x6e   : > { %2207 = vmatpush3.bf16.xpose.msra.mxu1 %v744_v47  ;;  %v2473_v47 = vld [vmem:[%s2676_s7 + $0x10] sm:$0xff]  }
  0x6f   : > { %2208 = vmatprep.subr.bf16.mxu1 %v2570_v0  ;;  %v1128_v49 = vsel %vm350_vm1, %v2473_v47, 0 }
  0x74   : > { %2189 = vmatpush3.bf16.xpose.msra.mxu0 %v619_v48  ;;  %v1253_v48 = vsel %vm350_vm1, %v2478_v46, 0 }
  0x75   : > { %2190 = vmatprep.subr.bf16.mxu0 %v2570_v0 }
  0x76   : > { %2209 = vmatpush3.bf16.xpose.msra.mxu1 %v747_v51  ;;  %v2475_v51 = vld [vmem:[%s2676_s7 + $0x18] sm:$0xff]  }
  0x77   : > { %2210 = vmatprep.subr.bf16.mxu1 %v2570_v0  ;;  %v1131_v53 = vsel %vm350_vm1, %v2475_v51, 0 }
  0x7c   : > { %2191 = vmatpush3.bf16.xpose.msra.mxu0 %v622_v52  ;;  %v1256_v52 = vsel %vm350_vm1, %v2480_v50, 0 }
  0x7d   : > { %2192 = vmatprep.subr.bf16.mxu0 %v2570_v0 }
  0x7e   : > { %2211 = vmatpush3.bf16.xpose.msra.mxu1 %v750_v55  ;;  %v2477_v55 = vld [vmem:[%s2676_s7 + $0x20] sm:$0xff]  }
  0x7f   : > { %2212 = vmatprep.subr.bf16.mxu1 %v2570_v0  ;;  %v1134_v57 = vsel %vm350_vm1, %v2477_v55, 0 }
  0x84   : > { %2193 = vmatpush3.bf16.xpose.msra.mxu0 %v625_v56  ;;  %v1259_v56 = vsel %vm350_vm1, %v2482_v54, 0 }
  0x85   : > { %2194 = vmatprep.subr.bf16.mxu0 %v2570_v0 }
  0x86   : > { %2213 = vmatpush3.bf16.xpose.msra.mxu1 %v753_v59  ;;  %v2479_v59 = vld [vmem:[%s2676_s7 + $0x28] sm:$0xff]  }
  0x87   : > { %2214 = vmatprep.subr.bf16.mxu1 %v2570_v0  ;;  %v1137_v61 = vsel %vm350_vm1, %v2479_v59, 0 }
  0x8c   : > { %2195 = vmatpush3.bf16.xpose.msra.mxu0 %v628_v60  ;;  %v1262_v60 = vsel %vm350_vm1, %v2484_v58, 0 }
  0x8d   : > { %2196 = vmatprep.subr.bf16.mxu0 %v2570_v0 }
  0x8e   : > { %2215 = vmatpush3.bf16.xpose.msra.mxu1 %v756_v63  ;;  %v2481_v63 = vld [vmem:[%s2676_s7 + $0x30] sm:$0xff]  }
  0x8f   : > { %2216 = vmatprep.subr.bf16.mxu1 %v2570_v0  ;;  %v1140_v2 = vsel %vm350_vm1, %v2481_v63, 0 }
  0x94   : > { %2197 = vmatpush3.bf16.xpose.msra.mxu0 %v631_v1  ;;  %v1265_v1 = vsel %vm350_vm1, %v2486_v62, 0 }
  0x95   : > { %2222 = vmatprep.subr.bf16.mxu0 %v2570_v0 }
  0x96   : > { %2217 = vmatpush3.bf16.xpose.msra.mxu1 %v759_v4  ;;  %v2483_v4 = vld [vmem:[%s2676_s7 + $0x38] sm:$0xff]   ;;  %s1943_s7 = sshll.u32 %s262_s9, 6 }
  0x97   : > { %2242 = vmatprep.subr.bf16.mxu1 %v2570_v0  ;;  %s2972_s10 = scalar_lea.vmem [#allocation3], %s1943_s7 }
  0x98   : > { %s1814_s11 = sshll.u32 %s2972_s10, 4  ;;  %s2983_s11 = int_to_ptr.vmem [resolvable:$true] %s1814_s11 }
  0x9b   : > { %2199 = vmatmul.mubr.msk.bf16.vlgmr.msra.gmra.mrb[4].mxu0 %vm350_vm1, %v1966_v5  ;;  %v1268_v5 = vsel %vm350_vm1, %v2488_v3, 0 }
  0x9c   : > { %2223 = vmatpush3.bf16.xpose.msra.mxu0 %v866_v6  ;;  %2238 = vmatprep.mubr.msk.bf16.mxu0 %vm2571_vm0, %v2570_v0  ;;  %v1143_v6 = vsel %vm350_vm1, %v2483_v4, 0 }
  0x9d   : > { %2224 = vmatprep.subr.bf16.mxu0 %v2570_v0  ;;  %2219 = vmatmul.mubr.msk.bf16.vlgmr.msra.gmra.mrb[4].mxu1 %vm350_vm1, %v1976_v8  ;;  %v2485_v8 = vld [vmem:[%s3041_s2] sm:$0xff]  }
  0x9e   : > { %2243 = vmatpush3.bf16.xpose.msra.mxu1 %v994_v10  ;;  %2258 = vmatprep.mubr.msk.bf16.mxu1 %vm2571_vm0, %v2570_v0  ;;  %v2006_v10 = vld [vmem:[%s3042_s3 + $0xc] sm:$0x3] }
  0x9f   : > { %2244 = vmatprep.subr.bf16.mxu1 %v2570_v0 }
  0xa4   : > { %2225 = vmatpush3.bf16.xpose.msra.mxu0 %v869_v11  ;;  %v1336_v11 = vsel %vm350_vm1, %v2485_v8, 0 }
  0xa5   : > { %2226 = vmatprep.subr.bf16.mxu0 %v2570_v0 }
  0xa6   : > { %2245 = vmatpush3.bf16.xpose.msra.mxu1 %v997_v14  ;;  %v1339_v14 = vsel %vm350_vm1, %v2487_v13, 0 }
  0xa7   : > { %2246 = vmatprep.subr.bf16.mxu1 %v2570_v0 }
  0xac   : > { %2227 = vmatpush3.bf16.xpose.msra.mxu0 %v872_v15  ;;  %v1316_v15 = vld [vmem:[%s271_s22] sm:$0xf]  ;;  %s2490_s22 = scalar_lea.vmem %s2983_s11, 1024 }
  0xad   : > { %2228 = vmatprep.subr.bf16.mxu0 %v2570_v0  ;;  %p2491_p12 = scmp.ne.s32.totalorder %s2983_s11, %s2490_s22 }
  0xae   : > { %2247 = vmatpush3.bf16.xpose.msra.mxu1 %v1000_v18 }
  0xaf   : > { %2248 = vmatprep.subr.bf16.mxu1 %v2570_v0  ;;  %p2492_p13 = pnand %p2491_p12, %p2647_p4 }
  0xb1   : > { %p2493_p0 = pneg %p2492_p13 }
  0xb4   : > { %2229 = vmatpush3.bf16.xpose.msra.mxu0 %v875_v19 }
  0xb5   : > { %2230 = vmatprep.subr.bf16.mxu0 %v2570_v0 }
  0xb6   : > { %2249 = vmatpush3.bf16.xpose.msra.mxu1 %v1003_v22 }
  0xb7   : > { %2250 = vmatprep.subr.bf16.mxu1 %v2570_v0 }
  0xbc   : > { %2231 = vmatpush3.bf16.xpose.msra.mxu0 %v878_v23 }
  0xbd   : > { %2232 = vmatprep.subr.bf16.mxu0 %v2570_v0 }
  0xbe   : > { %2251 = vmatpush3.bf16.xpose.msra.mxu1 %v1006_v26 }
  0xbf   : > { %2252 = vmatprep.subr.bf16.mxu1 %v2570_v0 }
  0xc4   : > { %2233 = vmatpush3.bf16.xpose.msra.mxu0 %v881_v27 }
  0xc5   : > { %2234 = vmatprep.subr.bf16.mxu0 %v2570_v0 }
  0xc6   : > { %2253 = vmatpush3.bf16.xpose.msra.mxu1 %v1009_v30 }
  0xc7   : > { %2254 = vmatprep.subr.bf16.mxu1 %v2570_v0 }
  0xcc   : > { %2235 = vmatpush3.bf16.xpose.msra.mxu0 %v884_v31 }
  0xcd   : > { %2236 = vmatprep.subr.bf16.mxu0 %v2570_v0 }
  0xce   : > { %2255 = vmatpush3.bf16.xpose.msra.mxu1 %v1012_v34 }
  0xcf   : > { %2256 = vmatprep.subr.bf16.mxu1 %v2570_v0 }
  0xd4   : > { %2237 = vmatpush3.bf16.xpose.msra.mxu0 %v887_v35 }
  0xd5   : > { %2262 = vmatprep.subr.bf16.mxu0 %v2570_v0 }
  0xd6   : > { %2257 = vmatpush3.bf16.xpose.msra.mxu1 %v1015_v38 }
  0xd7   : > { %2282 = vmatprep.subr.bf16.mxu1 %v2570_v0 }
  0xdb   : > { %2239 = vmatmul.mubr.msk.bf16.vlgmr.msra.gmra.mrb[8].mxu0 %vm350_vm1, %v1986_v39 }
  0xdc   : > { %2263 = vmatpush3.bf16.xpose.msra.mxu0 %v1122_v40  ;;  %2278 = vmatprep.mubr.msk.bf16.mxu0 %vm2571_vm0, %v2570_v0 }
  0xdd   : > { %2264 = vmatprep.subr.bf16.mxu0 %v2570_v0  ;;  %2259 = vmatmul.mubr.msk.bf16.vlgmr.msra.gmra.mrb[8].mxu1 %vm350_vm1, %v1996_v42 }
  0xde   : > { %2283 = vmatpush3.bf16.xpose.msra.mxu1 %v1250_v44  ;;  %2298 = vmatprep.mubr.msk.bf16.mxu1 %vm2571_vm0, %v2570_v0 }
  0xdf   : > { %2284 = vmatprep.subr.bf16.mxu1 %v2570_v0 }
  0xe4   : > { %2265 = vmatpush3.bf16.xpose.msra.mxu0 %v1125_v45 }
  0xe5   : > { %2266 = vmatprep.subr.bf16.mxu0 %v2570_v0 }
  0xe6   : > { %2285 = vmatpush3.bf16.xpose.msra.mxu1 %v1253_v48 }
  0xe7   : > { %2286 = vmatprep.subr.bf16.mxu1 %v2570_v0 }
  0xec   : > { %2267 = vmatpush3.bf16.xpose.msra.mxu0 %v1128_v49 }
  0xed   : > { %2268 = vmatprep.subr.bf16.mxu0 %v2570_v0 }
  0xee   : > { %2287 = vmatpush3.bf16.xpose.msra.mxu1 %v1256_v52 }
  0xef   : > { %2288 = vmatprep.subr.bf16.mxu1 %v2570_v0 }
  0xf4   : > { %2269 = vmatpush3.bf16.xpose.msra.mxu0 %v1131_v53 }
  0xf5   : > { %2270 = vmatprep.subr.bf16.mxu0 %v2570_v0 }
  0xf6   : > { %2289 = vmatpush3.bf16.xpose.msra.mxu1 %v1259_v56 }
  0xf7   : > { %2290 = vmatprep.subr.bf16.mxu1 %v2570_v0 }
  0xfc   : > { %2271 = vmatpush3.bf16.xpose.msra.mxu0 %v1134_v57 }
  0xfd   : > { %2272 = vmatprep.subr.bf16.mxu0 %v2570_v0 }
  0xfe   : > { %2291 = vmatpush3.bf16.xpose.msra.mxu1 %v1262_v60 }
  0xff   : > { %2292 = vmatprep.subr.bf16.mxu1 %v2570_v0 }
 0x104   : > { %2273 = vmatpush3.bf16.xpose.msra.mxu0 %v1137_v61 }
 0x105   : > { %2274 = vmatprep.subr.bf16.mxu0 %v2570_v0 }
 0x106   : > { %2293 = vmatpush3.bf16.xpose.msra.mxu1 %v1265_v1 }
 0x107   : > { %2294 = vmatprep.subr.bf16.mxu1 %v2570_v0 }
 0x10c   : > { %2275 = vmatpush3.bf16.xpose.msra.mxu0 %v1140_v2 }
 0x10d   : > { %2276 = vmatprep.subr.bf16.mxu0 %v2570_v0 }
 0x10e   : > { %2295 = vmatpush3.bf16.xpose.msra.mxu1 %v1268_v5 }
 0x10f   : > { %2296 = vmatprep.subr.bf16.mxu1 %v2570_v0 }
 0x114   : > { %2277 = vmatpush3.bf16.xpose.msra.mxu0 %v1143_v6 }
 0x115   : > { %2302 = vmatprep.subr.bf16.mxu0 %v2570_v0 }
 0x116   : > { %2297 = vmatpush3.bf16.xpose.msra.mxu1 %v1271_v9 }
 0x117   : > { %2310 = vmatprep.subr.bf16.mxu1 %v2570_v0 }
 0x11b   : > { %2279 = vmatmul.mubr.msk.bf16.vlgmr.msra.gmra.mrb[12].mxu0 %vm350_vm1, %v2006_v10 }
 0x11c   : > { %2303 = vmatpush3.bf16.xpose.msra.mxu0 %v1336_v11  ;;  %2306 = vmatprep.mubr.msk.bf16.mxu0 %vm2571_vm0, %v2570_v0 }
 0x11d   : > { %2304 = vmatprep.subr.bf16.mxu0 %v2570_v0  ;;  %2299 = vmatmul.mubr.msk.bf16.vlgmr.msra.gmra.mrb[12].mxu1 %vm350_vm1, %v2016_v12 }
 0x11e   : > { %2312 = vmatprep.mubr.msk.bf16.mxu1 %vm2571_vm0, %v2570_v0 }
 0x124   : > { %2305 = vmatpush3.bf16.xpose.msra.mxu0 %v1339_v14 }
 0x125   : > { %2322 = vmatprep.subr.bf16.mxu0 %v2570_v0 }
 0x12b   : > { %2307 = vmatmul.mubr.msk.bf16.vlgmr.msra.gmra.mrb[16].mxu0 %vm350_vm1, %v1316_v15 }
 0x12c   : > { %2324 = vmatprep.mubr.msk.bf16.mxu0 %vm2571_vm0, %v2570_v0 }
 0x12e   : > { %v412_v16 = vpop.f32.mrb[0].mxu0 }
 0x12f   : > { %v418_v17 = vpack.c.bf16 %v412_v16, %v412_v16  ;;  %v2160_v18 = vpop.f32.mrb[1].mxu0 }
 0x130   : > { %v415_v19 = vpop.f32.mrb[2].mxu0  ;;  %v539_v21 = vpop.f32.mrb[0].mxu1 }
 0x131   : > { %419 = vst [vmem:[#allocation2] sm:$0x3] %v418_v17  ;;  %v2161_v20 = vpop.f32.mrb[3].mxu0  ;;  %v545_v22 = vpack.c.bf16 %v539_v21, %v539_v21  ;;  %v2180_v23 = vpop.f32.mrb[1].mxu1 }
 0x132   : > { %v542_v24 = vpop.f32.mrb[2].mxu1 }
 0x133   : > { %547 = vst [vmem:[#allocation2 + $0x2] sm:$0x3] %v545_v22  ;;  %v2181_v25 = vpop.f32.mrb[3].mxu1 }
 0x138   : > { %v1382_v26 = vld [vmem:[#allocation2] sm:$0x3] }
 0x139   : > { %v1389_v27 = vsel %vm1387_vm2, %v1382_v26, 0 }
 0x13a   : > { %2311 = vmatpush3.bf16.msra.mxu1 %v1389_v27  ;;  %v1433_v63 = vld [vmem:[#allocation2 + $0x2] sm:$0x3] }
 0x13b   : > { %2316 = vmatprep.subr.bf16.mxu1 %v2570_v0  ;;  %v1441_v3 = vsel %vm1387_vm2, %v1433_v63, 0 }
 0x16e   : > { %v667_v28 = vpop.f32.mrb[4].mxu0 }
 0x16f   : > { %v673_v29 = vpack.c.bf16 %v667_v28, %v667_v28  ;;  %v2200_v30 = vpop.f32.mrb[5].mxu0 }
 0x170   : > { %v670_v31 = vpop.f32.mrb[6].mxu0  ;;  %v795_v33 = vpop.f32.mrb[4].mxu1 }
 0x171   : > { %675 = vst [vmem:[#allocation2 + $0x4] sm:$0x3] %v673_v29  ;;  %v2201_v32 = vpop.f32.mrb[7].mxu0  ;;  %v801_v34 = vpack.c.bf16 %v795_v33, %v795_v33  ;;  %v2220_v35 = vpop.f32.mrb[5].mxu1 }
 0x172   : > { %v798_v36 = vpop.f32.mrb[6].mxu1 }
 0x173   : > { %803 = vst [vmem:[#allocation2 + $0x6] sm:$0x3] %v801_v34  ;;  %v2221_v37 = vpop.f32.mrb[7].mxu1 }
 0x178   : > { %v1486_v38 = vld [vmem:[#allocation2 + $0x4] sm:$0x3] }
 0x179   : > { %v1493_v39 = vsel %vm1387_vm2, %v1486_v38, 0 }
 0x17a   : > { %2323 = vmatpush3.bf16.msra.mxu0 %v1493_v39  ;;  %v1538_v4 = vld [vmem:[#allocation2 + $0x6] sm:$0x3] }
 0x17b   : > { %2334 = vmatprep.subr.bf16.mxu0 %v2570_v0  ;;  %v1545_v6 = vsel %vm1387_vm2, %v1538_v4, 0 }
 0x1ae   : > { %v923_v40 = vpop.f32.mrb[8].mxu0 }
 0x1af   : > { %v929_v41 = vpack.c.bf16 %v923_v40, %v923_v40  ;;  %v2240_v42 = vpop.f32.mrb[9].mxu0 }
 0x1b0   : > { %v926_v43 = vpop.f32.mrb[10].mxu0  ;;  %v1051_v45 = vpop.f32.mrb[8].mxu1 }
 0x1b1   : > { %931 = vst [vmem:[#allocation2 + $0x8] sm:$0x3] %v929_v41  ;;  %v2241_v44 = vpop.f32.mrb[11].mxu0  ;;  %v1057_v46 = vpack.c.bf16 %v1051_v45, %v1051_v45  ;;  %v2260_v47 = vpop.f32.mrb[9].mxu1 }
 0x1b2   : > { %v1054_v48 = vpop.f32.mrb[10].mxu1 }
 0x1b3   : > { %1059 = vst [vmem:[#allocation2 + $0xa] sm:$0x3] %v1057_v46  ;;  %v2261_v49 = vpop.f32.mrb[11].mxu1 }
 0x1b8   : > { %v1590_v7 = vld [vmem:[#allocation2 + $0x8] sm:$0x3] }
 0x1b9   : > { %v1597_v9 = vsel %vm1387_vm2, %v1590_v7, 0 }
 0x1ba   : > { %v1642_v11 = vld [vmem:[#allocation2 + $0xa] sm:$0x3] }
 0x1bb   : > { %v1649_v12 = vsel %vm1387_vm2, %v1642_v11, 0 }
 0x1ee   : > { %v1179_v50 = vpop.f32.mrb[12].mxu0 }
 0x1ef   : > { %v1185_v51 = vpack.c.bf16 %v1179_v50, %v1179_v50  ;;  %v2280_v52 = vpop.f32.mrb[13].mxu0 }
 0x1f0   : > { %v1182_v53 = vpop.f32.mrb[14].mxu0  ;;  %v1307_v55 = vpop.f32.mrb[12].mxu1 }
 0x1f1   : > { %1187 = vst [vmem:[#allocation2 + $0xc] sm:$0x3] %v1185_v51  ;;  %v2281_v54 = vpop.f32.mrb[15].mxu0  ;;  %v1313_v56 = vpack.c.bf16 %v1307_v55, %v1307_v55  ;;  %v2300_v57 = vpop.f32.mrb[13].mxu1 }
 0x1f2   : > { %v1310_v58 = vpop.f32.mrb[14].mxu1 }
 0x1f3   : > { %1315 = vst [vmem:[#allocation2 + $0xe] sm:$0x3] %v1313_v56  ;;  %v2301_v59 = vpop.f32.mrb[15].mxu1 }
 0x1f8   : > { %v1694_v13 = vld [vmem:[#allocation2 + $0xc] sm:$0x3] }
 0x1f9   : > { %v1701_v16 = vsel %vm1387_vm2, %v1694_v13, 0 }
 0x1fa   : > { %v1746_v15 = vld [vmem:[#allocation2 + $0xe] sm:$0x3] }
 0x1fb   : > { %v1753_v17 = vsel %vm1387_vm2, %v1746_v15, 0 }
 0x1fe   : > { %v1375_v60 = vpop.f32.mrb[16].mxu0 }
 0x1ff   : > { %v1381_v61 = vpack.c.bf16 %v1375_v60, %v1375_v60  ;;  %v2308_v62 = vpop.f32.mrb[17].mxu0 }
 0x200   : > { %v1378_v1 = vpop.f32.mrb[18].mxu0 }
 0x201   : > { %1539 = vrot.lane.b32.xlu1 %v1381_v61, %s2572_s29  ;;  %1435 = vrot.lane.b32.xlu0 %v1381_v61, %s2573_s24  ;;  %v2309_v2 = vpop.f32.mrb[19].mxu0  ;;  %s2579_s29 = smov [#allocation3]  }
 0x202   : > { %2313 = vmatmul.mubr.msk.bf16.vlgmr.msra.gmra.mrb[16].mxu1 %vm1383_vm3, %v1381_v61  ;;  %s2494_s24 = sshll.u32 %s2579_s29, 4  ;;  %s2495_s24 = int_to_ptr.vmem [resolvable:$false] %s2494_s24 }
 0x203   : > { %2317 = vmatpush3.bf16.msra.mxu1 %v1441_v3  ;;  %2318 = vmatprep.mubr.msk.bf16.mxu1 %vm2571_vm0, %v2570_v0  ;;  %p2497_p1 = scmp.lt.s32.totalorder %s2983_s11, %s2495_s24 }
 0x204   : > { %2328 = vmatprep.subr.bf16.mxu1 %v2570_v0 }
 0x205   : > { %1591 = vrot.lane.b32.xlu1 %v1381_v61, %s2574_s26  ;;  %1487 = vrot.lane.b32.xlu0 %v1381_v61, %s2575_s30  ;;  %s2496_s26 = scalar_lea.vmem %s2495_s24, 2048 }
 0x206   : > { %p2498_p2 = scmp.lt.s32.totalorder %s2496_s26, %s2490_s22 }
 0x208   : > { %p2499_p3 = por %p2498_p2, %p2497_p1 }
 0x209   : > { %1695 = vrot.lane.b32.xlu1 %v1381_v61, %s2576_s5  ;;  %1643 = vrot.lane.b32.xlu0 %v1381_v61, %s2577_s6 }
 0x20a   : > { %p2500_p5 = pnand %p2499_p3, %p2493_p0 }
 0x20d   : > { %1747 = vrot.lane.b32.xlu0 %v1381_v61, %s2578_s8 }
 0x273   : > { %v1436_v5 = vpop.permute.xlu0 %1435  ;;  %v1540_v10 = vpop.permute.xlu1 %1539 }
 0x274   : > { %2319 = vmatmul.mubr.msk.bf16.vlgmr.msra.gmra.mrb[20].mxu1 %vm1383_vm3, %v1436_v5 }
 0x275   : > { %2329 = vmatpush3.bf16.msra.mxu1 %v1545_v6  ;;  %2330 = vmatprep.mubr.msk.bf16.mxu1 %vm2571_vm0, %v2570_v0 }
 0x276   : > { %2340 = vmatprep.subr.bf16.mxu1 %v2570_v0 }
 0x277   : > { %v1488_v8 = vpop.permute.xlu0 %1487  ;;  %v1592_v14 = vpop.permute.xlu1 %1591 }
 0x278   : > { %2325 = vmatmul.mubr.msk.bf16.vlgmr.msra.gmra.mrb[20].mxu0 %vm1383_vm3, %v1488_v8 }
 0x279   : > { %2335 = vmatpush3.bf16.msra.mxu0 %v1597_v9  ;;  %2336 = vmatprep.mubr.msk.bf16.mxu0 %vm2571_vm0, %v2570_v0 }
 0x27a   : > { %2346 = vmatprep.subr.bf16.mxu0 %v2570_v0 }
 0x27b   : > { %v1644_v18 = vpop.permute.xlu0 %1643  ;;  %v1696_v19 = vpop.permute.xlu1 %1695 }
 0x27c   : > { %2331 = vmatmul.mubr.msk.bf16.vlgmr.msra.gmra.mrb[24].mxu1 %vm1383_vm3, %v1540_v10 }
 0x27d   : > { %2341 = vmatpush3.bf16.msra.mxu1 %v1649_v12  ;;  %2342 = vmatprep.mubr.msk.bf16.mxu1 %vm2571_vm0, %v2570_v0 }
 0x27e   : > { %2352 = vmatprep.subr.bf16.mxu1 %v2570_v0 }
 0x27f   : > { %v1748_v20 = vpop.permute.xlu0 %1747 }
 0x280   : > { %2337 = vmatmul.mubr.msk.bf16.vlgmr.msra.gmra.mrb[24].mxu0 %vm1383_vm3, %v1592_v14 }
 0x281   : > { %2347 = vmatpush3.bf16.msra.mxu0 %v1701_v16  ;;  %2348 = vmatprep.mubr.msk.bf16.mxu0 %vm2571_vm0, %v2570_v0 }
 0x284   : > { %2343 = vmatmul.mubr.msk.bf16.vlgmr.msra.gmra.mrb[28].mxu1 %vm1383_vm3, %v1644_v18 }
 0x285   : > { %2353 = vmatpush3.bf16.msra.mxu1 %v1753_v17  ;;  %2354 = vmatprep.mubr.msk.bf16.mxu1 %vm2571_vm0, %v2570_v0 }
 0x288   : > { %2349 = vmatmul.mubr.msk.bf16.vlgmr.msra.gmra.mrb[28].mxu0 %vm1383_vm3, %v1696_v19 }
 0x28c   : > { %2355 = vmatmul.mubr.msk.bf16.vlgmr.msra.gmra.mrb[32].mxu1 %vm1383_vm3, %v1748_v20 }
 0x2d5   : > { %v1425_v21 = vpop.f32.mrb[16].mxu1 }
 0x2d6   : > { %1431 = vst [vmem:[%s2972_s10] sm:$0xff] %v1425_v21  ;;  %v2314_v22 = vpop.f32.mrb[17].mxu1 }
 0x2d7   : > { %v1428_v23 = vpop.f32.mrb[18].mxu1 }
 0x2d8   : > { %v2315_v0 = vpop.f32.mrb[19].mxu1 }
 0x347   : > { %v1477_v24 = vpop.f32.mrb[20].mxu1 }
 0x348   : > { %2031 = vst [vmem:[%s2972_s10 + $0x8] sm:$0xff] %v1477_v24  ;;  %v2320_v25 = vpop.f32.mrb[21].mxu1 }
 0x349   : > { %v1480_v26 = vpop.f32.mrb[22].mxu1 }
 0x34a   : > { %v2321_v27 = vpop.f32.mrb[23].mxu1 }
 0x34b   : > { %v1529_v28 = vpop.f32.mrb[20].mxu0 }
 0x34c   : > { %2033 = vst [vmem:[%s2972_s10 + $0x10] sm:$0xff] %v1529_v28  ;;  %v2326_v29 = vpop.f32.mrb[21].mxu0 }
 0x34d   : > { %v1532_v30 = vpop.f32.mrb[22].mxu0 }
 0x34e   : > { %v2327_v31 = vpop.f32.mrb[23].mxu0 }
 0x34f   : > { %v1581_v32 = vpop.f32.mrb[24].mxu1 }
 0x350   : > { %2035 = vst [vmem:[%s2972_s10 + $0x18] sm:$0xff] %v1581_v32  ;;  %v2332_v33 = vpop.f32.mrb[25].mxu1 }
 0x351   : > { %v1584_v34 = vpop.f32.mrb[26].mxu1 }
 0x352   : > { %v2333_v35 = vpop.f32.mrb[27].mxu1 }
 0x353   : > { %v1633_v36 = vpop.f32.mrb[24].mxu0 }
 0x354   : > { %2037 = vst [vmem:[%s2972_s10 + $0x20] sm:$0xff] %v1633_v36  ;;  %v2338_v37 = vpop.f32.mrb[25].mxu0 }
 0x355   : > { %v1636_v38 = vpop.f32.mrb[26].mxu0 }
 0x356   : > { %v2339_v39 = vpop.f32.mrb[27].mxu0 }
 0x357   : > { %v1685_v40 = vpop.f32.mrb[28].mxu1 }
 0x358   : > { %2039 = vst [vmem:[%s2972_s10 + $0x28] sm:$0xff] %v1685_v40  ;;  %v2344_v41 = vpop.f32.mrb[29].mxu1 }
 0x359   : > { %v1688_v42 = vpop.f32.mrb[30].mxu1 }
 0x35a   : > { %v2345_v43 = vpop.f32.mrb[31].mxu1 }
 0x35b   : > { %v1737_v44 = vpop.f32.mrb[28].mxu0 }
 0x35c   : > { %2041 = vst [vmem:[%s2972_s10 + $0x30] sm:$0xff] %v1737_v44  ;;  %v2350_v45 = vpop.f32.mrb[29].mxu0 }
 0x35d   : > { %v1740_v46 = vpop.f32.mrb[30].mxu0 }
 0x35e   : > { %v2351_v47 = vpop.f32.mrb[31].mxu0 }
 0x35f   : > { %v1789_v48 = vpop.f32.mrb[32].mxu1 }
 0x360   : > { %2043 = vst [vmem:[%s2972_s10 + $0x38] sm:$0xff] %v1789_v48  ;;  %v2356_v49 = vpop.f32.mrb[33].mxu1 }
 0x361   : > { %v1792_v50 = vpop.f32.mrb[34].mxu1 }
 0x362   : > { %2503 = shalt.err (!%p2500_p5)
}
 0x363   : > { %s2504_s30 = scalar_lea.hbm %s2988_s21, 1024  ;;  %s2508_s8 = scalar_lea.hbm %s3043_s4, 2048 }
 0x364   : > { %p2505_p6 = scmp.ne.s32.totalorder %s2988_s21, %s2504_s30  ;;  %p2509_p10 = scmp.lt.u32.totalorder %s2988_s21, %s3043_s4 }
 0x365   : > { %p2510_p11 = scmp.lt.u32.totalorder %s2508_s8, %s2504_s30  ;;  %p2512_p13 = scmp.lt.u32.totalorder %s2504_s30, %s2988_s21 }
 0x366   : > { %p2506_p7 = pnand %p2505_p6, %p2647_p4 }
 0x367   : > { %p2511_p12 = por %p2510_p11, %p2509_p10 }
 0x368   : > { %p2507_p9 = pneg %p2506_p7 }
 0x369   : > { %p2513_p0 = por %p2512_p13, %p2511_p12 }
 0x36b   : > { %p2514_p1 = pnand %p2513_p0, %p2507_p9 }
 0x36d   : > { %2517 = shalt.err (!%p2514_p1)
}
 0x36e   : > { %s2580_s10 = smov 128   ;;  %s2581_s12 = smov 8   ;;  %v2357_v51 = vpop.f32.mrb[35].mxu1 }
 0x36f   : > { %2358 = dma.vmem_to_hbm [thread:$0]  (%p2647_p4), %s2983_s11, 1024, %s2988_s21, %s2993_s18, %s2580_s10, %s2580_s10, %s2581_s12  }
 0x370 PF: > { %p2364_p2 = scmp.ge.s32.totalorder %s2568_s20, 2  ;;  %s1829_s13 = sand.u32 1, %s2548_s15  }
 0x371   : > { %s1830_s14 = scalar_lea.sflag [#allocation4], %s1829_s13 }
 0x372   : > { %p2361_p3 = pnand %p2364_p2, %p2654_p8 }
 0x374   : > { %2543 = dma.done.wait (!%p2361_p3), %s1830_s14, 1024  }
 0x375   : > { %2545 = vsyncadd (!%p2361_p3), %s1830_s14, 4294966272  ;;  %s17_s20 = sadd.s32 1, %s2568_s20   ;;  %s3046_s15 = smov %s2552_s16 }
 0x376   : > { %p14_p5 = scmp.ge.s32.totalorder %s17_s20, 4   ;;  %s3047_s16 = smov %s2556_s17 }
 0x377   : > { %s3048_s17 = smov %s2660_s28  ;;  %s3049_s18 = smov %s2564_s19 }
 0x378   : > { %s3050_s19 = smov %s3052_s23  ;;  %16 = sbr.rel (!%p14_p5) target bundleno = 4 (0x4), region = 112 }
 0x37f   :  { %1835 = vsyncpa [#allocation4], 1 }
 0x380   :  { %1837 = vsyncpa [#allocation4 + $0x1], 1 }

</bundles_post_ra>
